<compile_context>
chip_gen: v5e
topology: v5e:2x2
jax: 0.10.0
libtpu: 0.0.40
codegen_flags: <defaults>
</compile_context>

<pallas_src>
import functools

import jax
import jax.numpy as jnp
from jax import lax
from jax.experimental import pallas as pl
from jax.experimental.pallas import tpu as pltpu

LANE = 128
VMEM_LIMIT = 32 * 1024 * 1024     # explicit scoped-VMEM budget (safe on v5e/v6e/v7x)


def _round_up(x, m):
    return ((x + m - 1) // m) * m


def _pick_row_tile(Ho, Wp2, Cp_exp, stride, budget_bytes=4 << 20):
    """Largest row-tile whose f32 expanded window fits a modest VMEM budget.

    Prefers >= 2 tiles per image so the pipeline has something to overlap and both
    v7x TensorCores get work even at small batch."""
    divisors = [d for d in range(1, Ho + 1) if Ho % d == 0]
    fits = [d for d in divisors
            if ((d - 1) * stride + 3) * Wp2 * Cp_exp * 4 <= budget_bytes]
    if not fits:
        return 1
    multi = [d for d in fits if Ho // d >= 2]
    return max(multi) if multi else max(fits)


def _pad_last(a, target):
    pad = target - a.shape[-1]
    if pad == 0:
        return a
    return jnp.pad(a, [(0, 0)] * (a.ndim - 1) + [(0, pad)])


def _pad2(a, rows, cols):
    return jnp.pad(a, ((0, rows - a.shape[0]), (0, cols - a.shape[1])))


# ----------------------------- Pallas kernels ------------------------------------


def _expand_dw_kernel(xh_ref, we_ref, s0_ref, b0_ref, wd_ref, s1_ref, b1_ref,
                      dw_ref, pool_ref, *, TH, H, W, Wo, stride):
    # xh_ref : (1, H+2, Wp2, Cp_in)  bf16, spatially-padded input (resident per n)
    # we_ref : (Cp_in, Cp_exp)       bf16 1x1 expand weight
    # wd_ref : (9, Cp_exp)           f32 depthwise taps (row = dy*3 + dx)
    # dw_ref : (1, TH, Wo, Cp_exp)   bf16 output tile (post bn1 + relu6)
    # pool_ref: (1, 1, Cp_exp)       f32 running sum for SE global average pool
    t = pl.program_id(1)

    @pl.when(t == 0)
    def _init():
        pool_ref[...] = jnp.zeros_like(pool_ref)

    TIN = (TH - 1) * stride + 3                      # input rows needed (incl. 3x3 halo)
    Wp2 = xh_ref.shape[2]
    Cp_in = xh_ref.shape[3]
    Cp_exp = we_ref.shape[1]

    row0 = pl.multiple_of(t * (TH * stride), TH * stride)
    xwin = xh_ref[0, pl.ds(row0, TIN)]               # (TIN, Wp2, Cp_in) bf16

    # ---- 1x1 expand conv on the MXU (bf16 x bf16 -> f32) + folded bn0 + relu6 ----
    a = jnp.dot(xwin.reshape(TIN * Wp2, Cp_in), we_ref[...],
                preferred_element_type=jnp.float32)
    a = jnp.clip(a * s0_ref[...] + b0_ref[...], 0.0, 6.0)
    a = a.reshape(TIN, Wp2, Cp_exp)

    # The depthwise conv zero-pads ITS input, so halo pixels (computed above from
    # zero-padded x and therefore carrying only bn0-bias values) must be zeroed.
    row_id = row0 + lax.broadcasted_iota(jnp.int32, (TIN, Wp2, Cp_exp), 0)
    col_id = lax.broadcasted_iota(jnp.int32, (TIN, Wp2, Cp_exp), 1)
    interior = (row_id >= 1) & (row_id <= H) & (col_id >= 1) & (col_id <= W)
    a = jnp.where(interior, a, 0.0)

    # ---- 3x3 depthwise conv as 9 shifted multiply-adds (VPU), stride in-kernel ----
    # NOTE: the dx=1/2 taps are sublane-misaligned slices; pltpu.roll along the
    # sublane axis is a possible further micro-opt (XLU slot is idle here).
    wd = wd_ref[...]
    acc = jnp.zeros((TH, Wo, Cp_exp), jnp.float32)
    for dy in range(3):
        for dx in range(3):
            if stride == 1:
                tap = a[dy:dy + TH, dx:dx + Wo, :]
            else:
                tap = a[dy:dy + (TH - 1) * stride + 1:stride,
                        dx:dx + (Wo - 1) * stride + 1:stride, :]
            acc = acc + tap * wd[dy * 3 + dx]
    y = jnp.clip(acc * s1_ref[...] + b1_ref[...], 0.0, 6.0)     # folded bn1 + relu6

    dw_ref[0] = y.astype(dw_ref.dtype)
    # partial sum for the SE global average pool (accumulated across row tiles)
    pool_ref[...] += jnp.sum(y, axis=(0, 1), keepdims=True)


def _se_project_kernel(dw_ref, pool_ref, wr_ref, br_ref, we_ref, be_ref,
                       wp_ref, s2_ref, b2_ref, *rest, inv_hw, add_residual):
    # dw_ref  : (1, TH, Wo, Cp_exp) bf16 ; pool_ref: (1, 1, Cp_exp) f32 (sum over H*W)
    # wp_ref  : (Cp_exp, Cp_out) bf16    ; o_ref   : (1, TH, Wo, Cp_out) f32
    if add_residual:
        idn_ref, o_ref = rest
    else:
        (o_ref,) = rest

    x = dw_ref[0].astype(jnp.float32)                            # (TH, Wo, Cp_exp)

    # ---- squeeze & excite (tiny matmuls, recomputed per tile -- negligible) ----
    pooled = pool_ref[0] * inv_hw                                # (1, Cp_exp)
    red = jnp.dot(pooled, wr_ref[...], preferred_element_type=jnp.float32) + br_ref[...]
    red = jnp.maximum(red, 0.0)                                  # relu
    se = jnp.dot(red, we_ref[...], preferred_element_type=jnp.float32) + be_ref[...]
    se = jax.nn.sigmoid(se)                                      # (1, Cp_exp)
    x = x * se

    # ---- 1x1 project conv on the MXU + folded bn2 (+ residual) ----
    TH_, Wo_, Cp_exp = x.shape
    y = jnp.dot(x.reshape(TH_ * Wo_, Cp_exp).astype(jnp.bfloat16), wp_ref[...],
                preferred_element_type=jnp.float32)
    y = y * s2_ref[...] + b2_ref[...]
    y = y.reshape(TH_, Wo_, -1)
    if add_residual:
        y = y + idn_ref[0].astype(jnp.float32)
    o_ref[0] = y.astype(o_ref.dtype)


# ----------------------------- wrapper (glue) -------------------------------------


def mbconv_forward(x_nchw, params, *, stride=1):
    N, Cin, H, W = x_nchw.shape
    Cexp = params["w_expand"].shape[1]
    Cout = params["w_project"].shape[1]
    Csq = params["w_se_reduce"].shape[1]

    Cp_in = _round_up(Cin, LANE)
    Cp_exp = _round_up(Cexp, LANE)
    Cp_out = _round_up(Cout, LANE)
    Cp_sq = _round_up(Csq, LANE)

    Ho = (H - 1) // stride + 1
    Wo = (W - 1) // stride + 1
    Wp2 = _round_up(W + 2, 16)                 # width incl. halo, 16-aligned (bf16 tiles)
    TH = _pick_row_tile(Ho, Wp2, Cp_exp, stride)
    nT = Ho // TH
    add_residual = (stride == 1) and (Cout == Cin)

    f32, bf16 = jnp.float32, jnp.bfloat16

    # NHWC, channel-padded to the 128-lane width, bf16 activations.
    x_nhwc = jnp.transpose(x_nchw, (0, 2, 3, 1)).astype(f32)
    x_c = _pad_last(x_nhwc, Cp_in).astype(bf16)                         # (N, H, W, Cp_in)
    # Spatial halo for the 3x3 depthwise: only the small Cin-wide input is padded; the
    # Cexp-wide expanded tensor is never padded nor written to HBM.
    x_halo = jnp.pad(x_c, ((0, 0), (1, 1), (1, Wp2 - W - 1), (0, 0)))   # (N, H+2, Wp2, Cp_in)

    w_exp = _pad2(params["w_expand"], Cp_in, Cp_exp).astype(bf16)
    bn0_s = _pad_last(params["bn0_scale"], Cp_exp).astype(f32)
    bn0_b = _pad_last(params["bn0_bias"], Cp_exp).astype(f32)
    w_dw = _pad_last(params["w_dw"], Cp_exp).astype(f32)
    bn1_s = _pad_last(params["bn1_scale"], Cp_exp).astype(f32)
    bn1_b = _pad_last(params["bn1_bias"], Cp_exp).astype(f32)
    w_sr = _pad2(params["w_se_reduce"], Cp_exp, Cp_sq).astype(f32)
    b_sr = _pad_last(params["b_se_reduce"], Cp_sq).astype(f32)
    w_se = _pad2(params["w_se_expand"], Cp_sq, Cp_exp).astype(f32)
    b_se = _pad_last(params["b_se_expand"], Cp_exp).astype(f32)
    w_pr = _pad2(params["w_project"], Cp_exp, Cp_out).astype(bf16)
    bn2_s = _pad_last(params["bn2_scale"], Cp_out).astype(f32)
    bn2_b = _pad_last(params["bn2_bias"], Cp_out).astype(f32)

    # ---- kernel 1: fused expand + depthwise (+ SE pool partial sums) ----
    dw_out, pool_sum = pl.pallas_call(
        functools.partial(_expand_dw_kernel, TH=TH, H=H, W=W, Wo=Wo, stride=stride),
        out_shape=(jax.ShapeDtypeStruct((N, Ho, Wo, Cp_exp), bf16),
                   jax.ShapeDtypeStruct((N, 1, Cp_exp), f32)),
        grid=(N, nT),
        in_specs=[
            # full (padded) image block; block index is constant in t, so the input
            # stays resident in VMEM across all row tiles of one image.
            pl.BlockSpec((1, H + 2, Wp2, Cp_in), lambda n, t: (n, 0, 0, 0)),
            pl.BlockSpec((Cp_in, Cp_exp), lambda n, t: (0, 0)),
            pl.BlockSpec((1, Cp_exp), lambda n, t: (0, 0)),
            pl.BlockSpec((1, Cp_exp), lambda n, t: (0, 0)),
            pl.BlockSpec((9, Cp_exp), lambda n, t: (0, 0)),
            pl.BlockSpec((1, Cp_exp), lambda n, t: (0, 0)),
            pl.BlockSpec((1, Cp_exp), lambda n, t: (0, 0)),
        ],
        out_specs=(
            pl.BlockSpec((1, TH, Wo, Cp_exp), lambda n, t: (n, t, 0, 0)),
            pl.BlockSpec((1, 1, Cp_exp), lambda n, t: (n, 0, 0)),   # pool accumulator
        ),
        compiler_params=pltpu.CompilerParams(
            dimension_semantics=("parallel", "arbitrary"),
            vmem_limit_bytes=VMEM_LIMIT),
    )(x_halo, w_exp, bn0_s, bn0_b, w_dw, bn1_s, bn1_b)

    # ---- kernel 2: SE gate + 1x1 project + bn2 (+ residual) ----
    in_specs = [
        pl.BlockSpec((1, TH, Wo, Cp_exp), lambda n, t: (n, t, 0, 0)),
        pl.BlockSpec((1, 1, Cp_exp), lambda n, t: (n, 0, 0)),
        pl.BlockSpec((Cp_exp, Cp_sq), lambda n, t: (0, 0)),
        pl.BlockSpec((1, Cp_sq), lambda n, t: (0, 0)),
        pl.BlockSpec((Cp_sq, Cp_exp), lambda n, t: (0, 0)),
        pl.BlockSpec((1, Cp_exp), lambda n, t: (0, 0)),
        pl.BlockSpec((Cp_exp, Cp_out), lambda n, t: (0, 0)),
        pl.BlockSpec((1, Cp_out), lambda n, t: (0, 0)),
        pl.BlockSpec((1, Cp_out), lambda n, t: (0, 0)),
    ]
    args = [dw_out, pool_sum, w_sr, b_sr, w_se, b_se, w_pr, bn2_s, bn2_b]
    if add_residual:
        # identity tensor only DMA'd when the residual branch is actually taken
        in_specs.append(pl.BlockSpec((1, TH, W, Cp_in), lambda n, t: (n, t, 0, 0)))
        args.append(x_c)

    out = pl.pallas_call(
        functools.partial(_se_project_kernel, inv_hw=1.0 / float(Ho * Wo),
                          add_residual=add_residual),
        out_shape=jax.ShapeDtypeStruct((N, Ho, Wo, Cp_out), f32),
        grid=(N, nT),
        in_specs=in_specs,
        out_specs=pl.BlockSpec((1, TH, Wo, Cp_out), lambda n, t: (n, t, 0, 0)),
        compiler_params=pltpu.CompilerParams(
            dimension_semantics=("parallel", "parallel"),
            vmem_limit_bytes=VMEM_LIMIT),
    )(*args)

    out = out[..., :Cout]                                 # drop padded output channels
    return jnp.transpose(out, (0, 3, 1, 2))               # back to NCHW


# ----------------------------- params & reference ---------------------------------


def init_params(key, in_channels, out_channels, expand_ratio, se_ratio=0.25):
    Cexp = in_channels * expand_ratio
    Csq = max(1, int(in_channels * se_ratio))
    eps = 1e-5
    keys = iter(jax.random.split(key, 32))

    def rnd(shape, scale=0.1):
        return (scale * jax.random.normal(next(keys), shape)).astype(jnp.float32)

    def bn_fold(C):
        gamma = 1.0 + rnd((1, C))
        beta = rnd((1, C))
        mean = rnd((1, C))
        var = jnp.abs(rnd((1, C))) + 0.5
        scale = gamma / jnp.sqrt(var + eps)
        bias = beta - mean * scale
        return scale.astype(jnp.float32), bias.astype(jnp.float32)

    p = {}
    p["w_expand"] = rnd((in_channels, Cexp), 0.3)                 # 1x1 conv (Cin -> Cexp)
    p["bn0_scale"], p["bn0_bias"] = bn_fold(Cexp)
    p["w_dw"] = rnd((9, Cexp), 0.3)                               # 3x3 depthwise, row = dy*3+dx
    p["bn1_scale"], p["bn1_bias"] = bn_fold(Cexp)
    p["w_se_reduce"] = rnd((Cexp, Csq), 0.3)
    p["b_se_reduce"] = rnd((1, Csq), 0.1)
    p["w_se_expand"] = rnd((Csq, Cexp), 0.3)
    p["b_se_expand"] = rnd((1, Cexp), 0.1)
    p["w_project"] = rnd((Cexp, out_channels), 0.3)               # 1x1 conv (Cexp -> Cout)
    p["bn2_scale"], p["bn2_bias"] = bn_fold(out_channels)
    return p


def mbconv_reference(x_nchw, params, *, stride=1):
    # Pure-JAX reference (einsum + lax.conv), mirroring the kernel's bf16 storage points
    # so the comparison isolates real bugs rather than bf16 quantization noise.
    f32 = jnp.float32
    hi = lax.Precision.HIGHEST
    q = lambda v: v.astype(jnp.bfloat16).astype(f32)

    x = jnp.transpose(x_nchw, (0, 2, 3, 1)).astype(f32)
    xq = q(x)
    Cexp = params["w_expand"].shape[1]

    y = jnp.einsum("nhwc,cd->nhwd", xq, q(params["w_expand"]), precision=hi)
    y = jnp.clip(y * params["bn0_scale"] + params["bn0_bias"], 0.0, 6.0)

    wd = params["w_dw"].reshape(3, 3, Cexp)[:, :, None, :]        # HWIO, I=1 per group
    dw = lax.conv_general_dilated(
        y, wd, window_strides=(stride, stride), padding=((1, 1), (1, 1)),
        dimension_numbers=("NHWC", "HWIO", "NHWC"), feature_group_count=Cexp,
        precision=hi)
    dw = jnp.clip(dw * params["bn1_scale"] + params["bn1_bias"], 0.0, 6.0)

    pooled = jnp.mean(dw, axis=(1, 2))                            # (N, Cexp), f32
    red = jnp.maximum(
        jnp.dot(pooled, params["w_se_reduce"], precision=hi) + params["b_se_reduce"], 0.0)
    se = jax.nn.sigmoid(
        jnp.dot(red, params["w_se_expand"], precision=hi) + params["b_se_expand"])

    scaled = q(q(dw) * se[:, None, None, :])
    out = jnp.einsum("nhwc,cd->nhwd", scaled, q(params["w_project"]), precision=hi)
    out = out * params["bn2_scale"] + params["bn2_bias"]
    if stride == 1 and out.shape == x.shape:
        out = out + xq
    return jnp.transpose(out, (0, 3, 1, 2))


# ----------------------------- main ------------------------------------------------


if __name__ == "__main__":
    key = jax.random.PRNGKey(0)
    k_x, k_p = jax.random.split(key)

    N, Cin, H, W = 2, 4, 16, 16
    out_channels, expand_ratio, stride = 4, 4, 1      # residual path active

    x = jax.random.normal(k_x, (N, Cin, H, W), dtype=jnp.float32)   # NCHW (PyTorch convention)
    params = init_params(k_p, Cin, out_channels, expand_ratio)

    fwd = jax.jit(functools.partial(mbconv_forward, stride=stride))
    out = jax.block_until_ready(fwd(x, params))
    ref = mbconv_reference(x, params, stride=stride)

    assert out.shape == (N, out_channels, H, W), out.shape
    max_err = float(jnp.max(jnp.abs(out - ref)))
    if not max_err < 5e-2:
        raise AssertionError(f"mismatch vs reference: max abs err = {max_err}")
    print("KERNEL_OK")
</pallas_src>

<mosaic_0001>
module attributes {stable_mosaic.version = 11 : i64} {
  func.func @_expand_dw_kernel(%arg0: i32, %arg1: i32, %arg2: memref<1x18x32x128xbf16, #tpu.memory_space<vmem>>, %arg3: memref<128x128xbf16, #tpu.memory_space<vmem>>, %arg4: memref<1x128xf32, #tpu.memory_space<vmem>>, %arg5: memref<1x128xf32, #tpu.memory_space<vmem>>, %arg6: memref<9x128xf32, #tpu.memory_space<vmem>>, %arg7: memref<1x128xf32, #tpu.memory_space<vmem>>, %arg8: memref<1x128xf32, #tpu.memory_space<vmem>>, %arg9: memref<1x8x16x128xbf16, #tpu.memory_space<vmem>>, %arg10: memref<1x1x128xf32, #tpu.memory_space<vmem>>) attributes {dimension_semantics = [#tpu.dimension_semantics<parallel>, #tpu.dimension_semantics<arbitrary>], iteration_bounds = array<i64: 2, 2>, scalar_prefetch = 0 : i64, scratch_operands = 0 : i64, tpu.core_type = #tpu.core_type<tc>, window_params = [{transform_indices = @transform_0, window_bounds = array<i64: 1, 18, 32, 128>}, {pipeline_mode = #tpu.pipeline_mode<synchronous>, transform_indices = @transform_1, window_bounds = array<i64: 128, 128>}, {pipeline_mode = #tpu.pipeline_mode<synchronous>, transform_indices = @transform_2, window_bounds = array<i64: 1, 128>}, {pipeline_mode = #tpu.pipeline_mode<synchronous>, transform_indices = @transform_3, window_bounds = array<i64: 1, 128>}, {pipeline_mode = #tpu.pipeline_mode<synchronous>, transform_indices = @transform_4, window_bounds = array<i64: 9, 128>}, {pipeline_mode = #tpu.pipeline_mode<synchronous>, transform_indices = @transform_5, window_bounds = array<i64: 1, 128>}, {pipeline_mode = #tpu.pipeline_mode<synchronous>, transform_indices = @transform_6, window_bounds = array<i64: 1, 128>}, {transform_indices = @transform_7, window_bounds = array<i64: 1, 8, 16, 128>}, {transform_indices = @transform_8, window_bounds = array<i64: 1, 1, 128>}]} {
    %c0_i32 = arith.constant 0 : i32
    %0 = arith.cmpi eq, %arg1, %c0_i32 : i32
    %1 = arith.extui %0 : i1 to i32
    %c0_i32_0 = arith.constant 0 : i32
    %2 = arith.cmpi ne, %1, %c0_i32_0 : i32
    scf.if %2 {
      %cst_34 = arith.constant 0.000000e+00 : f32
      %125 = vector.broadcast %cst_34 : f32 to vector<1x1x128xf32>
      %c0_35 = arith.constant 0 : index
      %c0_36 = arith.constant 0 : index
      %c0_37 = arith.constant 0 : index
      %126 = vector.load %arg10[%c0_35, %c0_36, %c0_37] : memref<1x1x128xf32, #tpu.memory_space<vmem>>, vector<1x1x128xf32>
      tpu.vector_store %arg10[%c0_35, %c0_36, %c0_37], %125 {strides = array<i32>} : memref<1x1x128xf32, #tpu.memory_space<vmem>>, vector<1x1x128xf32>,
    } else {
    }
    %c8_i32 = arith.constant 8 : i32
    %3 = arith.muli %arg1, %c8_i32 : i32
    %4 = tpu.assume_multiple %3, 8 : i32
    %c0 = arith.constant 0 : index
    %5 = arith.index_cast %4 : i32 to index
    %c0_1 = arith.constant 0 : index
    %c0_2 = arith.constant 0 : index
    %6 = vector.load %arg2[%c0, %5, %c0_1, %c0_2] : memref<1x18x32x128xbf16, #tpu.memory_space<vmem>>, vector<1x10x32x128xbf16>
    %7 = vector.shape_cast %6 : vector<1x10x32x128xbf16> to vector<10x32x128xbf16>
    %8 = vector.shape_cast %7 : vector<10x32x128xbf16> to vector<320x128xbf16>
    %c0_3 = arith.constant 0 : index
    %c0_4 = arith.constant 0 : index
    %9 = vector.load %arg3[%c0_3, %c0_4] : memref<128x128xbf16, #tpu.memory_space<vmem>>, vector<128x128xbf16>
    %cst = arith.constant dense<0.000000e+00> : vector<320x128xf32>
    %10 = tpu.matmul %8, %9, %cst {dimension_numbers = #tpu.dot_dimension_numbers<[1], [0], [0], [1], [0, 0, 1, 1], [], []>} : vector<320x128xbf16>, vector<128x128xbf16>, vector<320x128xf32> -> vector<320x128xf32>
    %c0_5 = arith.constant 0 : index
    %c0_6 = arith.constant 0 : index
    %11 = vector.load %arg4[%c0_5, %c0_6] : memref<1x128xf32, #tpu.memory_space<vmem>>, vector<1x128xf32>
    %12 = vector.broadcast %11 : vector<1x128xf32> to vector<320x128xf32>
    %13 = arith.mulf %10, %12 : vector<320x128xf32>
    %c0_7 = arith.constant 0 : index
    %c0_8 = arith.constant 0 : index
    %14 = vector.load %arg5[%c0_7, %c0_8] : memref<1x128xf32, #tpu.memory_space<vmem>>, vector<1x128xf32>
    %15 = vector.broadcast %14 : vector<1x128xf32> to vector<320x128xf32>
    %16 = arith.addf %13, %15 : vector<320x128xf32>
    %cst_9 = arith.constant 0.000000e+00 : f32
    %cst_10 = arith.constant 6.000000e+00 : f32
    %17 = vector.broadcast %cst_9 : f32 to vector<320x128xf32>
    %18 = arith.maximumf %17, %16 : vector<320x128xf32>
    %19 = vector.broadcast %cst_10 : f32 to vector<320x128xf32>
    %20 = arith.minimumf %19, %18 : vector<320x128xf32>
    %21 = vector.shape_cast %20 : vector<320x128xf32> to vector<10x32x128xf32>
    %22 = tpu.iota {dimensions = array<i32: 0>} : vector<10x32x128xi32>
    %23 = vector.broadcast %4 : i32 to vector<10x32x128xi32>
    %24 = arith.addi %23, %22 : vector<10x32x128xi32>
    %25 = tpu.iota {dimensions = array<i32: 1>} : vector<10x32x128xi32>
    %c1_i32 = arith.constant 1 : i32
    %26 = vector.broadcast %c1_i32 : i32 to vector<10x32x128xi32>
    %27 = arith.cmpi sge, %24, %26 : vector<10x32x128xi32>
    %c16_i32 = arith.constant 16 : i32
    %28 = vector.broadcast %c16_i32 : i32 to vector<10x32x128xi32>
    %29 = arith.cmpi sle, %24, %28 : vector<10x32x128xi32>
    %30 = arith.andi %27, %29 : vector<10x32x128xi1>
    %c1_i32_11 = arith.constant 1 : i32
    %31 = vector.broadcast %c1_i32_11 : i32 to vector<10x32x128xi32>
    %32 = arith.cmpi sge, %25, %31 : vector<10x32x128xi32>
    %33 = arith.andi %30, %32 : vector<10x32x128xi1>
    %c16_i32_12 = arith.constant 16 : i32
    %34 = vector.broadcast %c16_i32_12 : i32 to vector<10x32x128xi32>
    %35 = arith.cmpi sle, %25, %34 : vector<10x32x128xi32>
    %36 = arith.andi %33, %35 : vector<10x32x128xi1>
    %cst_13 = arith.constant 0.000000e+00 : f32
    %37 = vector.broadcast %cst_13 : f32 to vector<10x32x128xf32>
    %38 = arith.select %36, %21, %37 : vector<10x32x128xi1>, vector<10x32x128xf32>
    %c0_14 = arith.constant 0 : index
    %c0_15 = arith.constant 0 : index
    %39 = vector.load %arg6[%c0_14, %c0_15] : memref<9x128xf32, #tpu.memory_space<vmem>>, vector<9x128xf32>
    %cst_16 = arith.constant 0.000000e+00 : f32
    %40 = vector.broadcast %cst_16 : f32 to vector<8x16x128xf32>
    %41 = vector.extract_strided_slice %38 {offsets = [0, 0, 0], sizes = [8, 16, 128], strides = [1, 1, 1]} : vector<10x32x128xf32> to vector<8x16x128xf32>
    %42 = vector.extract_strided_slice %39 {offsets = [0, 0], sizes = [1, 128], strides = [1, 1]} : vector<9x128xf32> to vector<1x128xf32>
    %43 = vector.shape_cast %42 : vector<1x128xf32> to vector<128xf32>
    %44 = vector.shape_cast %43 : vector<128xf32> to vector<1x1x128xf32>
    %45 = vector.broadcast %44 : vector<1x1x128xf32> to vector<8x16x128xf32>
    %46 = arith.mulf %41, %45 : vector<8x16x128xf32>
    %47 = arith.addf %40, %46 : vector<8x16x128xf32>
    %48 = vector.extract_strided_slice %38 {offsets = [0, 1, 0], sizes = [8, 16, 128], strides = [1, 1, 1]} : vector<10x32x128xf32> to vector<8x16x128xf32>
    %49 = vector.extract_strided_slice %39 {offsets = [1, 0], sizes = [1, 128], strides = [1, 1]} : vector<9x128xf32> to vector<1x128xf32>
    %50 = vector.shape_cast %49 : vector<1x128xf32> to vector<128xf32>
    %51 = vector.shape_cast %50 : vector<128xf32> to vector<1x1x128xf32>
    %52 = vector.broadcast %51 : vector<1x1x128xf32> to vector<8x16x128xf32>
    %53 = arith.mulf %48, %52 : vector<8x16x128xf32>
    %54 = arith.addf %47, %53 : vector<8x16x128xf32>
    %55 = vector.extract_strided_slice %38 {offsets = [0, 2, 0], sizes = [8, 16, 128], strides = [1, 1, 1]} : vector<10x32x128xf32> to vector<8x16x128xf32>
    %56 = vector.extract_strided_slice %39 {offsets = [2, 0], sizes = [1, 128], strides = [1, 1]} : vector<9x128xf32> to vector<1x128xf32>
    %57 = vector.shape_cast %56 : vector<1x128xf32> to vector<128xf32>
    %58 = vector.shape_cast %57 : vector<128xf32> to vector<1x1x128xf32>
    %59 = vector.broadcast %58 : vector<1x1x128xf32> to vector<8x16x128xf32>
    %60 = arith.mulf %55, %59 : vector<8x16x128xf32>
    %61 = arith.addf %54, %60 : vector<8x16x128xf32>
    %62 = vector.extract_strided_slice %38 {offsets = [1, 0, 0], sizes = [8, 16, 128], strides = [1, 1, 1]} : vector<10x32x128xf32> to vector<8x16x128xf32>
    %63 = vector.extract_strided_slice %39 {offsets = [3, 0], sizes = [1, 128], strides = [1, 1]} : vector<9x128xf32> to vector<1x128xf32>
    %64 = vector.shape_cast %63 : vector<1x128xf32> to vector<128xf32>
    %65 = vector.shape_cast %64 : vector<128xf32> to vector<1x1x128xf32>
    %66 = vector.broadcast %65 : vector<1x1x128xf32> to vector<8x16x128xf32>
    %67 = arith.mulf %62, %66 : vector<8x16x128xf32>
    %68 = arith.addf %61, %67 : vector<8x16x128xf32>
    %69 = vector.extract_strided_slice %38 {offsets = [1, 1, 0], sizes = [8, 16, 128], strides = [1, 1, 1]} : vector<10x32x128xf32> to vector<8x16x128xf32>
    %70 = vector.extract_strided_slice %39 {offsets = [4, 0], sizes = [1, 128], strides = [1, 1]} : vector<9x128xf32> to vector<1x128xf32>
    %71 = vector.shape_cast %70 : vector<1x128xf32> to vector<128xf32>
    %72 = vector.shape_cast %71 : vector<128xf32> to vector<1x1x128xf32>
    %73 = vector.broadcast %72 : vector<1x1x128xf32> to vector<8x16x128xf32>
    %74 = arith.mulf %69, %73 : vector<8x16x128xf32>
    %75 = arith.addf %68, %74 : vector<8x16x128xf32>
    %76 = vector.extract_strided_slice %38 {offsets = [1, 2, 0], sizes = [8, 16, 128], strides = [1, 1, 1]} : vector<10x32x128xf32> to vector<8x16x128xf32>
    %77 = vector.extract_strided_slice %39 {offsets = [5, 0], sizes = [1, 128], strides = [1, 1]} : vector<9x128xf32> to vector<1x128xf32>
    %78 = vector.shape_cast %77 : vector<1x128xf32> to vector<128xf32>
    %79 = vector.shape_cast %78 : vector<128xf32> to vector<1x1x128xf32>
    %80 = vector.broadcast %79 : vector<1x1x128xf32> to vector<8x16x128xf32>
    %81 = arith.mulf %76, %80 : vector<8x16x128xf32>
    %82 = arith.addf %75, %81 : vector<8x16x128xf32>
    %83 = vector.extract_strided_slice %38 {offsets = [2, 0, 0], sizes = [8, 16, 128], strides = [1, 1, 1]} : vector<10x32x128xf32> to vector<8x16x128xf32>
    %84 = vector.extract_strided_slice %39 {offsets = [6, 0], sizes = [1, 128], strides = [1, 1]} : vector<9x128xf32> to vector<1x128xf32>
    %85 = vector.shape_cast %84 : vector<1x128xf32> to vector<128xf32>
    %86 = vector.shape_cast %85 : vector<128xf32> to vector<1x1x128xf32>
    %87 = vector.broadcast %86 : vector<1x1x128xf32> to vector<8x16x128xf32>
    %88 = arith.mulf %83, %87 : vector<8x16x128xf32>
    %89 = arith.addf %82, %88 : vector<8x16x128xf32>
    %90 = vector.extract_strided_slice %38 {offsets = [2, 1, 0], sizes = [8, 16, 128], strides = [1, 1, 1]} : vector<10x32x128xf32> to vector<8x16x128xf32>
    %91 = vector.extract_strided_slice %39 {offsets = [7, 0], sizes = [1, 128], strides = [1, 1]} : vector<9x128xf32> to vector<1x128xf32>
    %92 = vector.shape_cast %91 : vector<1x128xf32> to vector<128xf32>
    %93 = vector.shape_cast %92 : vector<128xf32> to vector<1x1x128xf32>
    %94 = vector.broadcast %93 : vector<1x1x128xf32> to vector<8x16x128xf32>
    %95 = arith.mulf %90, %94 : vector<8x16x128xf32>
    %96 = arith.addf %89, %95 : vector<8x16x128xf32>
    %97 = vector.extract_strided_slice %38 {offsets = [2, 2, 0], sizes = [8, 16, 128], strides = [1, 1, 1]} : vector<10x32x128xf32> to vector<8x16x128xf32>
    %98 = vector.extract_strided_slice %39 {offsets = [8, 0], sizes = [1, 128], strides = [1, 1]} : vector<9x128xf32> to vector<1x128xf32>
    %99 = vector.shape_cast %98 : vector<1x128xf32> to vector<128xf32>
    %100 = vector.shape_cast %99 : vector<128xf32> to vector<1x1x128xf32>
    %101 = vector.broadcast %100 : vector<1x1x128xf32> to vector<8x16x128xf32>
    %102 = arith.mulf %97, %101 : vector<8x16x128xf32>
    %103 = arith.addf %96, %102 : vector<8x16x128xf32>
    %c0_17 = arith.constant 0 : index
    %c0_18 = arith.constant 0 : index
    %104 = vector.load %arg7[%c0_17, %c0_18] : memref<1x128xf32, #tpu.memory_space<vmem>>, vector<1x128xf32>
    %105 = vector.shape_cast %104 : vector<1x128xf32> to vector<1x1x128xf32>
    %106 = vector.broadcast %105 : vector<1x1x128xf32> to vector<8x16x128xf32>
    %107 = arith.mulf %103, %106 : vector<8x16x128xf32>
    %c0_19 = arith.constant 0 : index
    %c0_20 = arith.constant 0 : index
    %108 = vector.load %arg8[%c0_19, %c0_20] : memref<1x128xf32, #tpu.memory_space<vmem>>, vector<1x128xf32>
    %109 = vector.shape_cast %108 : vector<1x128xf32> to vector<1x1x128xf32>
    %110 = vector.broadcast %109 : vector<1x1x128xf32> to vector<8x16x128xf32>
    %111 = arith.addf %107, %110 : vector<8x16x128xf32>
    %cst_21 = arith.constant 0.000000e+00 : f32
    %cst_22 = arith.constant 6.000000e+00 : f32
    %112 = vector.broadcast %cst_21 : f32 to vector<8x16x128xf32>
    %113 = arith.maximumf %112, %111 : vector<8x16x128xf32>
    %114 = vector.broadcast %cst_22 : f32 to vector<8x16x128xf32>
    %115 = arith.minimumf %114, %113 : vector<8x16x128xf32>
    %116 = arith.truncf %115 : vector<8x16x128xf32> to vector<8x16x128xbf16>
    %c0_23 = arith.constant 0 : index
    %c0_24 = arith.constant 0 : index
    %c0_25 = arith.constant 0 : index
    %c0_26 = arith.constant 0 : index
    %117 = vector.load %arg9[%c0_23, %c0_24, %c0_25, %c0_26] : memref<1x8x16x128xbf16, #tpu.memory_space<vmem>>, vector<1x8x16x128xbf16>
    %118 = vector.shape_cast %117 : vector<1x8x16x128xbf16> to vector<8x16x128xbf16>
    %119 = vector.shape_cast %116 : vector<8x16x128xbf16> to vector<1x8x16x128xbf16>
    tpu.vector_store %arg9[%c0_23, %c0_24, %c0_25, %c0_26], %119 {strides = array<i32>} : memref<1x8x16x128xbf16, #tpu.memory_space<vmem>>, vector<1x8x16x128xbf16>,
    %c0_27 = arith.constant 0 : index
    %c0_28 = arith.constant 0 : index
    %c0_29 = arith.constant 0 : index
    %120 = vector.load %arg10[%c0_27, %c0_28, %c0_29] : memref<1x1x128xf32, #tpu.memory_space<vmem>>, vector<1x1x128xf32>
    %cst_30 = arith.constant dense<0.000000e+00> : vector<128xf32>
    %121 = vector.multi_reduction <add>, %115, %cst_30 [0, 1] : vector<8x16x128xf32> to vector<128xf32>
    %122 = vector.shape_cast %121 : vector<128xf32> to vector<1x1x128xf32>
    %123 = arith.addf %120, %122 : vector<1x1x128xf32>
    %c0_31 = arith.constant 0 : index
    %c0_32 = arith.constant 0 : index
    %c0_33 = arith.constant 0 : index
    %124 = vector.load %arg10[%c0_31, %c0_32, %c0_33] : memref<1x1x128xf32, #tpu.memory_space<vmem>>, vector<1x1x128xf32>
    tpu.vector_store %arg10[%c0_31, %c0_32, %c0_33], %123 {strides = array<i32>} : memref<1x1x128xf32, #tpu.memory_space<vmem>>, vector<1x1x128xf32>,
    return
  }
  func.func @transform_0(%arg0: i32, %arg1: i32) -> (i32, i32, i32, i32) {
    %c0_i32 = arith.constant 0 : i32
    %c0_i32_0 = arith.constant 0 : i32
    %c0_i32_1 = arith.constant 0 : i32
    %c0_i32_2 = arith.constant 0 : i32
    return %arg0, %c0_i32, %c0_i32_0, %c0_i32_1 : i32, i32, i32, i32
  }
  func.func @transform_1(%arg0: i32, %arg1: i32) -> (i32, i32) {
    %c0_i32 = arith.constant 0 : i32
    %c0_i32_0 = arith.constant 0 : i32
    %c0_i32_1 = arith.constant 0 : i32
    return %c0_i32, %c0_i32_0 : i32, i32
  }
  func.func @transform_2(%arg0: i32, %arg1: i32) -> (i32, i32) {
    %c0_i32 = arith.constant 0 : i32
    %c0_i32_0 = arith.constant 0 : i32
    %c0_i32_1 = arith.constant 0 : i32
    return %c0_i32, %c0_i32_0 : i32, i32
  }
  func.func @transform_3(%arg0: i32, %arg1: i32) -> (i32, i32) {
    %c0_i32 = arith.constant 0 : i32
    %c0_i32_0 = arith.constant 0 : i32
    %c0_i32_1 = arith.constant 0 : i32
    return %c0_i32, %c0_i32_0 : i32, i32
  }
  func.func @transform_4(%arg0: i32, %arg1: i32) -> (i32, i32) {
    %c0_i32 = arith.constant 0 : i32
    %c0_i32_0 = arith.constant 0 : i32
    %c0_i32_1 = arith.constant 0 : i32
    return %c0_i32, %c0_i32_0 : i32, i32
  }
  func.func @transform_5(%arg0: i32, %arg1: i32) -> (i32, i32) {
    %c0_i32 = arith.constant 0 : i32
    %c0_i32_0 = arith.constant 0 : i32
    %c0_i32_1 = arith.constant 0 : i32
    return %c0_i32, %c0_i32_0 : i32, i32
  }
  func.func @transform_6(%arg0: i32, %arg1: i32) -> (i32, i32) {
    %c0_i32 = arith.constant 0 : i32
    %c0_i32_0 = arith.constant 0 : i32
    %c0_i32_1 = arith.constant 0 : i32
    return %c0_i32, %c0_i32_0 : i32, i32
  }
  func.func @transform_7(%arg0: i32, %arg1: i32) -> (i32, i32, i32, i32) {
    %c0_i32 = arith.constant 0 : i32
    %c0_i32_0 = arith.constant 0 : i32
    %c0_i32_1 = arith.constant 0 : i32
    return %arg0, %arg1, %c0_i32, %c0_i32_0 : i32, i32, i32, i32
  }
  func.func @transform_8(%arg0: i32, %arg1: i32) -> (i32, i32, i32) {
    %c0_i32 = arith.constant 0 : i32
    %c0_i32_0 = arith.constant 0 : i32
    %c0_i32_1 = arith.constant 0 : i32
    return %arg0, %c0_i32, %c0_i32_0 : i32, i32, i32
  }
}

module attributes {stable_mosaic.version = 11 : i64} {
  func.func @_se_project_kernel(%arg0: i32, %arg1: i32, %arg2: memref<1x8x16x128xbf16, #tpu.memory_space<vmem>>, %arg3: memref<1x1x128xf32, #tpu.memory_space<vmem>>, %arg4: memref<128x128xf32, #tpu.memory_space<vmem>>, %arg5: memref<1x128xf32, #tpu.memory_space<vmem>>, %arg6: memref<128x128xf32, #tpu.memory_space<vmem>>, %arg7: memref<1x128xf32, #tpu.memory_space<vmem>>, %arg8: memref<128x128xbf16, #tpu.memory_space<vmem>>, %arg9: memref<1x128xf32, #tpu.memory_space<vmem>>, %arg10: memref<1x128xf32, #tpu.memory_space<vmem>>, %arg11: memref<1x8x16x128xbf16, #tpu.memory_space<vmem>>, %arg12: memref<1x8x16x128xf32, #tpu.memory_space<vmem>>) attributes {dimension_semantics = [#tpu.dimension_semantics<parallel>, #tpu.dimension_semantics<parallel>], iteration_bounds = array<i64: 2, 2>, scalar_prefetch = 0 : i64, scratch_operands = 0 : i64, tpu.core_type = #tpu.core_type<tc>, window_params = [{transform_indices = @transform_0, window_bounds = array<i64: 1, 8, 16, 128>}, {transform_indices = @transform_1, window_bounds = array<i64: 1, 1, 128>}, {pipeline_mode = #tpu.pipeline_mode<synchronous>, transform_indices = @transform_2, window_bounds = array<i64: 128, 128>}, {pipeline_mode = #tpu.pipeline_mode<synchronous>, transform_indices = @transform_3, window_bounds = array<i64: 1, 128>}, {pipeline_mode = #tpu.pipeline_mode<synchronous>, transform_indices = @transform_4, window_bounds = array<i64: 128, 128>}, {pipeline_mode = #tpu.pipeline_mode<synchronous>, transform_indices = @transform_5, window_bounds = array<i64: 1, 128>}, {pipeline_mode = #tpu.pipeline_mode<synchronous>, transform_indices = @transform_6, window_bounds = array<i64: 128, 128>}, {pipeline_mode = #tpu.pipeline_mode<synchronous>, transform_indices = @transform_7, window_bounds = array<i64: 1, 128>}, {pipeline_mode = #tpu.pipeline_mode<synchronous>, transform_indices = @transform_8, window_bounds = array<i64: 1, 128>}, {transform_indices = @transform_9, window_bounds = array<i64: 1, 8, 16, 128>}, {transform_indices = @transform_10, window_bounds = array<i64: 1, 8, 16, 128>}]} {
    %c0 = arith.constant 0 : index
    %c0_0 = arith.constant 0 : index
    %c0_1 = arith.constant 0 : index
    %c0_2 = arith.constant 0 : index
    %0 = vector.load %arg2[%c0, %c0_0, %c0_1, %c0_2] : memref<1x8x16x128xbf16, #tpu.memory_space<vmem>>, vector<1x8x16x128xbf16>
    %1 = vector.shape_cast %0 : vector<1x8x16x128xbf16> to vector<8x16x128xbf16>
    %2 = arith.extf %1 : vector<8x16x128xbf16> to vector<8x16x128xf32>
    %c0_3 = arith.constant 0 : index
    %c0_4 = arith.constant 0 : index
    %c0_5 = arith.constant 0 : index
    %3 = vector.load %arg3[%c0_3, %c0_4, %c0_5] : memref<1x1x128xf32, #tpu.memory_space<vmem>>, vector<1x1x128xf32>
    %4 = vector.shape_cast %3 : vector<1x1x128xf32> to vector<1x128xf32>
    %cst = arith.constant 3.906250e-03 : f32
    %5 = vector.broadcast %cst : f32 to vector<1x128xf32>
    %6 = arith.mulf %4, %5 : vector<1x128xf32>
    %c0_6 = arith.constant 0 : index
    %c0_7 = arith.constant 0 : index
    %7 = vector.load %arg4[%c0_6, %c0_7] : memref<128x128xf32, #tpu.memory_space<vmem>>, vector<128x128xf32>
    %cst_8 = arith.constant dense<0.000000e+00> : vector<1x128xf32>
    %8 = tpu.matmul %6, %7, %cst_8 {dimension_numbers = #tpu.dot_dimension_numbers<[1], [0], [0], [1], [0, 0, 1, 1], [], []>} : vector<1x128xf32>, vector<128x128xf32>, vector<1x128xf32> -> vector<1x128xf32>
    %c0_9 = arith.constant 0 : index
    %c0_10 = arith.constant 0 : index
    %9 = vector.load %arg5[%c0_9, %c0_10] : memref<1x128xf32, #tpu.memory_space<vmem>>, vector<1x128xf32>
    %10 = arith.addf %8, %9 : vector<1x128xf32>
    %cst_11 = arith.constant 0.000000e+00 : f32
    %11 = vector.broadcast %cst_11 : f32 to vector<1x128xf32>
    %12 = arith.maximumf %10, %11 : vector<1x128xf32>
    %c0_12 = arith.constant 0 : index
    %c0_13 = arith.constant 0 : index
    %13 = vector.load %arg6[%c0_12, %c0_13] : memref<128x128xf32, #tpu.memory_space<vmem>>, vector<128x128xf32>
    %cst_14 = arith.constant dense<0.000000e+00> : vector<1x128xf32>
    %14 = tpu.matmul %12, %13, %cst_14 {dimension_numbers = #tpu.dot_dimension_numbers<[1], [0], [0], [1], [0, 0, 1, 1], [], []>} : vector<1x128xf32>, vector<128x128xf32>, vector<1x128xf32> -> vector<1x128xf32>
    %c0_15 = arith.constant 0 : index
    %c0_16 = arith.constant 0 : index
    %15 = vector.load %arg7[%c0_15, %c0_16] : memref<1x128xf32, #tpu.memory_space<vmem>>, vector<1x128xf32>
    %16 = arith.addf %14, %15 : vector<1x128xf32>
    %17 = arith.negf %16 : vector<1x128xf32>
    %18 = math.exp %17 : vector<1x128xf32>
    %cst_17 = arith.constant 1.000000e+00 : f32
    %19 = vector.broadcast %cst_17 : f32 to vector<1x128xf32>
    %20 = arith.addf %19, %18 : vector<1x128xf32>
    %21 = arith.divf %19, %20 : vector<1x128xf32>
    %22 = vector.shape_cast %21 : vector<1x128xf32> to vector<1x1x128xf32>
    %23 = vector.broadcast %22 : vector<1x1x128xf32> to vector<8x16x128xf32>
    %24 = arith.mulf %2, %23 : vector<8x16x128xf32>
    %25 = vector.shape_cast %24 : vector<8x16x128xf32> to vector<128x128xf32>
    %26 = arith.truncf %25 : vector<128x128xf32> to vector<128x128xbf16>
    %c0_18 = arith.constant 0 : index
    %c0_19 = arith.constant 0 : index
    %27 = vector.load %arg8[%c0_18, %c0_19] : memref<128x128xbf16, #tpu.memory_space<vmem>>, vector<128x128xbf16>
    %cst_20 = arith.constant dense<0.000000e+00> : vector<128x128xf32>
    %28 = tpu.matmul %26, %27, %cst_20 {dimension_numbers = #tpu.dot_dimension_numbers<[1], [0], [0], [1], [0, 0, 1, 1], [], []>} : vector<128x128xbf16>, vector<128x128xbf16>, vector<128x128xf32> -> vector<128x128xf32>
    %c0_21 = arith.constant 0 : index
    %c0_22 = arith.constant 0 : index
    %29 = vector.load %arg9[%c0_21, %c0_22] : memref<1x128xf32, #tpu.memory_space<vmem>>, vector<1x128xf32>
    %30 = vector.broadcast %29 : vector<1x128xf32> to vector<128x128xf32>
    %31 = arith.mulf %28, %30 : vector<128x128xf32>
    %c0_23 = arith.constant 0 : index
    %c0_24 = arith.constant 0 : index
    %32 = vector.load %arg10[%c0_23, %c0_24] : memref<1x128xf32, #tpu.memory_space<vmem>>, vector<1x128xf32>
    %33 = vector.broadcast %32 : vector<1x128xf32> to vector<128x128xf32>
    %34 = arith.addf %31, %33 : vector<128x128xf32>
    %35 = vector.shape_cast %34 : vector<128x128xf32> to vector<8x16x128xf32>
    %c0_25 = arith.constant 0 : index
    %c0_26 = arith.constant 0 : index
    %c0_27 = arith.constant 0 : index
    %c0_28 = arith.constant 0 : index
    %36 = vector.load %arg11[%c0_25, %c0_26, %c0_27, %c0_28] : memref<1x8x16x128xbf16, #tpu.memory_space<vmem>>, vector<1x8x16x128xbf16>
    %37 = vector.shape_cast %36 : vector<1x8x16x128xbf16> to vector<8x16x128xbf16>
    %38 = arith.extf %37 : vector<8x16x128xbf16> to vector<8x16x128xf32>
    %39 = arith.addf %35, %38 : vector<8x16x128xf32>
    %c0_29 = arith.constant 0 : index
    %c0_30 = arith.constant 0 : index
    %c0_31 = arith.constant 0 : index
    %c0_32 = arith.constant 0 : index
    %40 = vector.load %arg12[%c0_29, %c0_30, %c0_31, %c0_32] : memref<1x8x16x128xf32, #tpu.memory_space<vmem>>, vector<1x8x16x128xf32>
    %41 = vector.shape_cast %40 : vector<1x8x16x128xf32> to vector<8x16x128xf32>
    %42 = vector.shape_cast %39 : vector<8x16x128xf32> to vector<1x8x16x128xf32>
    tpu.vector_store %arg12[%c0_29, %c0_30, %c0_31, %c0_32], %42 {strides = array<i32>} : memref<1x8x16x128xf32, #tpu.memory_space<vmem>>, vector<1x8x16x128xf32>,
    return
  }
  func.func @transform_0(%arg0: i32, %arg1: i32) -> (i32, i32, i32, i32) {
    %c0_i32 = arith.constant 0 : i32
    %c0_i32_0 = arith.constant 0 : i32
    %c0_i32_1 = arith.constant 0 : i32
    return %arg0, %arg1, %c0_i32, %c0_i32_0 : i32, i32, i32, i32
  }
  func.func @transform_1(%arg0: i32, %arg1: i32) -> (i32, i32, i32) {
    %c0_i32 = arith.constant 0 : i32
    %c0_i32_0 = arith.constant 0 : i32
    %c0_i32_1 = arith.constant 0 : i32
    return %arg0, %c0_i32, %c0_i32_0 : i32, i32, i32
  }
  func.func @transform_2(%arg0: i32, %arg1: i32) -> (i32, i32) {
    %c0_i32 = arith.constant 0 : i32
    %c0_i32_0 = arith.constant 0 : i32
    %c0_i32_1 = arith.constant 0 : i32
    return %c0_i32, %c0_i32_0 : i32, i32
  }
  func.func @transform_3(%arg0: i32, %arg1: i32) -> (i32, i32) {
    %c0_i32 = arith.constant 0 : i32
    %c0_i32_0 = arith.constant 0 : i32
    %c0_i32_1 = arith.constant 0 : i32
    return %c0_i32, %c0_i32_0 : i32, i32
  }
  func.func @transform_4(%arg0: i32, %arg1: i32) -> (i32, i32) {
    %c0_i32 = arith.constant 0 : i32
    %c0_i32_0 = arith.constant 0 : i32
    %c0_i32_1 = arith.constant 0 : i32
    return %c0_i32, %c0_i32_0 : i32, i32
  }
  func.func @transform_5(%arg0: i32, %arg1: i32) -> (i32, i32) {
    %c0_i32 = arith.constant 0 : i32
    %c0_i32_0 = arith.constant 0 : i32
    %c0_i32_1 = arith.constant 0 : i32
    return %c0_i32, %c0_i32_0 : i32, i32
  }
  func.func @transform_6(%arg0: i32, %arg1: i32) -> (i32, i32) {
    %c0_i32 = arith.constant 0 : i32
    %c0_i32_0 = arith.constant 0 : i32
    %c0_i32_1 = arith.constant 0 : i32
    return %c0_i32, %c0_i32_0 : i32, i32
  }
  func.func @transform_7(%arg0: i32, %arg1: i32) -> (i32, i32) {
    %c0_i32 = arith.constant 0 : i32
    %c0_i32_0 = arith.constant 0 : i32
    %c0_i32_1 = arith.constant 0 : i32
    return %c0_i32, %c0_i32_0 : i32, i32
  }
  func.func @transform_8(%arg0: i32, %arg1: i32) -> (i32, i32) {
    %c0_i32 = arith.constant 0 : i32
    %c0_i32_0 = arith.constant 0 : i32
    %c0_i32_1 = arith.constant 0 : i32
    return %c0_i32, %c0_i32_0 : i32, i32
  }
  func.func @transform_9(%arg0: i32, %arg1: i32) -> (i32, i32, i32, i32) {
    %c0_i32 = arith.constant 0 : i32
    %c0_i32_0 = arith.constant 0 : i32
    %c0_i32_1 = arith.constant 0 : i32
    return %arg0, %arg1, %c0_i32, %c0_i32_0 : i32, i32, i32, i32
  }
  func.func @transform_10(%arg0: i32, %arg1: i32) -> (i32, i32, i32, i32) {
    %c0_i32 = arith.constant 0 : i32
    %c0_i32_0 = arith.constant 0 : i32
    %c0_i32_1 = arith.constant 0 : i32
    return %arg0, %arg1, %c0_i32, %c0_i32_0 : i32, i32, i32, i32
  }
}

</mosaic_0001>

<bundles_post_ra>
// kernel: mbconv_forward.3
= control target key start
LH: loop header
LB: loop body
LE: loop exit
PB: predicated region body
PF: predicated region fallthrough
CT: control target
= control target key end

     0   :  { %s1251_s13 = smov 0   ;;  %s1253_s14 = smov 0   ;;  %s1533_s0 = inlined_call_operand.vmem [shape: bf16[2,16,16,128], index: 0, kind: input, shape index: {}]   ;;  %s1534_s1 = inlined_call_operand.vmem [shape: f32[2,1,128], index: 1, kind: input, shape index: {}]   ;;  %s1535_s2 = inlined_call_operand.vmem [shape: f32[128,128], index: 2, kind: input, shape index: {}]   ;;  %s1536_s3 = inlined_call_operand.vmem [shape: f32[1,128], index: 3, kind: input, shape index: {}]   ;;  %s1537_s4 = inlined_call_operand.vmem [shape: f32[128,128], index: 4, kind: input, shape index: {}]   ;;  %s1538_s5 = inlined_call_operand.vmem [shape: f32[1,128], index: 5, kind: input, shape index: {}]   ;;  %s1539_s6 = inlined_call_operand.vmem [shape: bf16[128,128], index: 6, kind: input, shape index: {}]   ;;  %s1540_s7 = inlined_call_operand.vmem [shape: f32[1,128], index: 7, kind: input, shape index: {}]   ;;  %s1541_s8 = inlined_call_operand.vmem [shape: f32[1,128], index: 8, kind: input, shape index: {}]   ;;  %s1542_s9 = inlined_call_operand.vmem [shape: bf16[2,16,16,128], index: 9, kind: input, shape index: {}]   ;;  %s1543_s10 = inlined_call_operand.vmem [shape: f32[2,16,16,128], index: 10, kind: output, shape index: {}]  }
   0x1   :  { %s1255_s15 = smov 0   ;;  %s1257_s16 = smov 0  }
   0x2   :  { %s1259_s17 = smov 0  }
   0x3 LB: > { %s29_s18 = sadd.s32 1, %s1186_s15  ;;  %s32_s19 = sadd.s32 1, %s1190_s16  ;;  %s1194_s17 = sphi %s1259_s17, %s20_s17   ;;  %s1190_s16 = sphi %s1257_s16, %s1547_s16   ;;  %s1186_s15 = sphi %s1255_s15, %s1546_s15   ;;  %s1182_s14 = sphi %s1253_s14, %s1545_s14   ;;  %s1178_s13 = sphi %s1251_s13, %s1544_s13  }
   0x4   : > { %p30_p0 = scmp.ge.s32.totalorder %s29_s18, 2  ;;  %p960_p1 = scmp.ge.s32.totalorder %s1194_s17, 1 }
   0x5   : > { %p360_p2 = scmp.lt.s32.totalorder %s1194_s17, 5 }
   0x6   : > { %s1549_s18 = smov (%p30_p0, %s29_s18), 0  ;;  %s1551_s19 = smov (!%p30_p0, %s32_s19), %s1190_s16 }
   0x7   : > { %p361_p3 = pnand %p960_p1, %p360_p2  ;;  %p34_p4 = scmp.ge.s32.totalorder %s1551_s19, 2 }
   0x8   : > { %p422_p5 = scmp.lt.s32.totalorder (!%p361_p3), %s1182_s14, 1  ;;  %s961_s29 = sshll.u32 (!%p361_p3), %s1178_s13, 3 }
   0x9   : > { %s1553_s19 = smov (%p34_p4, %s1551_s19), 0  ;;  %364 = sbr.rel (%p361_p3) target bundleno = 518 (0x206), region = 60 }
   0xa   : > { %p424_p6 = scmp.lt.s32.totalorder (!%p361_p3), %s961_s29, 15 }
   0xe   : > { %v506_v0 = vld [vmem:[%s1535_s2 + $0x78] sm:$0xff]  ;;  %v505_v1 = vld [vmem:[%s1535_s2 + $0x70] sm:$0xff]  ;;  %v504_v2 = vld [vmem:[%s1535_s2 + $0x68] sm:$0xff]  ;;  %s1555_s14 = smov (!%p422_p5, %s1182_s14), 1  ;;  %s1557_s29 = smov (!%p424_p6, %s961_s29), 15 }
   0xf   : > { %508 = vmatpush.msra.mxu1 %v506_v0  ;;  %v503_v3 = vld [vmem:[%s1535_s2 + $0x60] sm:$0xff]  ;;  %v502_v4 = vld [vmem:[%s1535_s2 + $0x58] sm:$0xff]  ;;  %v501_v5 = vld [vmem:[%s1535_s2 + $0x50] sm:$0xff]  ;;  %s434_s22 = scalar_lea.vmem %s1534_s1, %s1555_s14  ;;  %s962_s30 = sshll.u32 %s1557_s29, 1 }
  0x10   : > { %v500_v6 = vld [vmem:[%s1535_s2 + $0x48] sm:$0xff]  ;;  %v499_v7 = vld [vmem:[%s1535_s2 + $0x40] sm:$0xff]  ;;  %v498_v8 = vld [vmem:[%s1535_s2 + $0x38] sm:$0xff]  ;;  %s963_s11 = sshll.u32 %s1555_s14, 5 }
  0x11   : > { %509 = vmatpush.msra.mxu1 %v505_v1  ;;  %v497_v9 = vld [vmem:[%s1535_s2 + $0x30] sm:$0xff]  ;;  %v496_v10 = vld [vmem:[%s1535_s2 + $0x28] sm:$0xff]  ;;  %v495_v11 = vld [vmem:[%s1535_s2 + $0x20] sm:$0xff]  ;;  %s1421_s12 = sadd.s32 %s963_s11, %s962_s30 }
  0x12   : > { %v494_v12 = vld [vmem:[%s1535_s2 + $0x18] sm:$0xff]  ;;  %v493_v13 = vld [vmem:[%s1535_s2 + $0x10] sm:$0xff]  ;;  %v489_v14 = vld [vmem:[%s434_s22] sm:$0x1]  ;;  %s964_s20 = sshll.u32 %s1421_s12, 2  ;;  %s972_s29 = sshll.u32 %s1421_s12, 3 }
  0x13   : > { %510 = vmatpush.msra.mxu1 %v504_v2  ;;  %v492_v15 = vld [vmem:[%s1535_s2 + $0x8] sm:$0xff]  ;;  %v491_v16 = vld [vmem:[%s1535_s2] sm:$0xff]  ;;  %v490_v17 = vmul.f32 0.00390625, %v489_v14  ;;  %v544_v18 = vld [vmem:[%s1537_s4 + $0x78] sm:$0xff]  ;;  %s1429_s22 = scalar_lea.vmem %s1533_s0, %s964_s20  ;;  %s1444_s24 = scalar_lea.vmem %s1542_s9, %s964_s20 }
  0x14   : > { %v543_v19 = vld [vmem:[%s1537_s4 + $0x70] sm:$0xff]  ;;  %v542_v20 = vld [vmem:[%s1537_s4 + $0x68] sm:$0xff]  ;;  %v541_v21 = vld [vmem:[%s1537_s4 + $0x60] sm:$0xff]  ;;  %s1463_s20 = scalar_lea.vmem %s1543_s10, %s972_s29 }
  0x15   : > { %511 = vmatpush.msra.mxu1 %v503_v3  ;;  %v540_v22 = vld [vmem:[%s1537_s4 + $0x58] sm:$0xff]  ;;  %v539_v23 = vld [vmem:[%s1537_s4 + $0x50] sm:$0xff]  ;;  %v538_v24 = vld [vmem:[%s1537_s4 + $0x48] sm:$0xff] }
  0x16   : > { %v537_v25 = vld [vmem:[%s1537_s4 + $0x40] sm:$0xff]  ;;  %v536_v26 = vld [vmem:[%s1537_s4 + $0x38] sm:$0xff]  ;;  %v535_v27 = vld [vmem:[%s1537_s4 + $0x30] sm:$0xff] }
  0x17   : > { %512 = vmatpush.msra.mxu1 %v502_v4  ;;  %v534_v28 = vld [vmem:[%s1537_s4 + $0x28] sm:$0xff]  ;;  %v533_v29 = vld [vmem:[%s1537_s4 + $0x20] sm:$0xff]  ;;  %v532_v30 = vld [vmem:[%s1537_s4 + $0x18] sm:$0xff] }
  0x18   : > { %v531_v31 = vld [vmem:[%s1537_s4 + $0x10] sm:$0xff]  ;;  %v530_v32 = vld [vmem:[%s1537_s4 + $0x8] sm:$0xff]  ;;  %v529_v33 = vld [vmem:[%s1537_s4] sm:$0xff] }
  0x19   : > { %513 = vmatpush.msra.mxu1 %v501_v5  ;;  %v507_v34 = vld [vmem:[%s1536_s3] sm:$0x1]  ;;  %v1015_v38 = vld [vmem:[%s1539_s6 + $0x38] sm:$0xff]  ;;  %v1014_v39 = vld [vmem:[%s1539_s6 + $0x30] sm:$0xff] }
  0x1a   : > { %674 = vmatpush.bf16.msra.mxu0 %v1015_v38  ;;  %1094 = vmatpush.bf16.msra.mxu2 %v1015_v38  ;;  %v1013_v40 = vld [vmem:[%s1539_s6 + $0x28] sm:$0xff]  ;;  %v1012_v41 = vld [vmem:[%s1539_s6 + $0x20] sm:$0xff]  ;;  %v1011_v42 = vld [vmem:[%s1539_s6 + $0x18] sm:$0xff] }
  0x1b   : > { %514 = vmatpush.msra.mxu1 %v500_v6  ;;  %1095 = vmatpush.bf16.msra.mxu3 %v1015_v38  ;;  %v1010_v43 = vld [vmem:[%s1539_s6 + $0x10] sm:$0xff]  ;;  %v1009_v44 = vld [vmem:[%s1539_s6 + $0x8] sm:$0xff]  ;;  %v545_v45 = vld [vmem:[%s1538_s5] sm:$0x1] }
  0x1c   : > { %v1008_v46 = vld [vmem:[%s1539_s6] sm:$0xff]  ;;  %v1081_v59 = vld [vmem:[%s1429_s22 + $0x10] sm:$0xff]   ;;  %v1084_v61 = vld [vmem:[%s1429_s22 + $0x28] sm:$0xff]  }
  0x1d   : > { %515 = vmatpush.msra.mxu1 %v499_v7  ;;  %v1017_v58 = vld [vmem:[%s1429_s22] sm:$0xff]   ;;  %v1026_v2 = vunpack.c.l.bf16 %v1081_v59  ;;  %v1027_v3 = vunpack.c.h.bf16 %v1081_v59  ;;  %v1038_v5 = vunpack.c.l.bf16 %v1084_v61  ;;  %v1039_v6 = vunpack.c.h.bf16 %v1084_v61 }
  0x1e   : > { %675 = vmatpush.bf16.msra.mxu0 %v1014_v39  ;;  %1096 = vmatpush.bf16.msra.mxu2 %v1014_v39  ;;  %v1018_v63 = vunpack.c.l.bf16 %v1017_v58  ;;  %v1019_v0 = vunpack.c.h.bf16 %v1017_v58 }
  0x1f   : > { %516 = vmatpush.msra.mxu1 %v498_v8  ;;  %1097 = vmatpush.bf16.msra.mxu3 %v1014_v39 }
  0x21   : > { %517 = vmatpush.msra.mxu1 %v497_v9 }
  0x22   : > { %676 = vmatpush.bf16.msra.mxu0 %v1013_v40  ;;  %1098 = vmatpush.bf16.msra.mxu2 %v1013_v40 }
  0x23   : > { %518 = vmatpush.msra.mxu1 %v496_v10  ;;  %1099 = vmatpush.bf16.msra.mxu3 %v1013_v40 }
  0x25   : > { %519 = vmatpush.msra.mxu1 %v495_v11 }
  0x26   : > { %677 = vmatpush.bf16.msra.mxu0 %v1012_v41  ;;  %1100 = vmatpush.bf16.msra.mxu2 %v1012_v41 }
  0x27   : > { %520 = vmatpush.msra.mxu1 %v494_v12  ;;  %1101 = vmatpush.bf16.msra.mxu3 %v1012_v41 }
  0x29   : > { %521 = vmatpush.msra.mxu1 %v493_v13 }
  0x2a   : > { %678 = vmatpush.bf16.msra.mxu0 %v1011_v42  ;;  %1102 = vmatpush.bf16.msra.mxu2 %v1011_v42 }
  0x2b   : > { %522 = vmatpush.msra.mxu1 %v492_v15  ;;  %1103 = vmatpush.bf16.msra.mxu3 %v1011_v42 }
  0x2d   : > { %523 = vmatpush.msra.mxu1 %v491_v16 }
  0x2e   : > { %524 = vmatmul.f32.vlgmr.msra.gmra.mxu1 %v490_v17  ;;  %679 = vmatpush.bf16.msra.mxu0 %v1010_v43  ;;  %v1080_v17 = vld [vmem:[%s1429_s22 + $0x8] sm:$0xff]  }
  0x2f   : > { %546 = vmatpush.msrb.mxu1 %v544_v18  ;;  %1104 = vmatpush.bf16.msra.mxu2 %v1010_v43  ;;  %v1082_v18 = vld [vmem:[%s1429_s22 + $0x18] sm:$0xff]  }
  0x30   : > { %1105 = vmatpush.bf16.msra.mxu3 %v1010_v43 }
  0x31   : > { %547 = vmatpush.msrb.mxu1 %v543_v19  ;;  %v1085_v19 = vld [vmem:[%s1429_s22 + $0x30] sm:$0xff]  }
  0x32   : > { %680 = vmatpush.bf16.msra.mxu0 %v1009_v44 }
  0x33   : > { %548 = vmatpush.msrb.mxu1 %v542_v20  ;;  %1106 = vmatpush.bf16.msra.mxu2 %v1009_v44  ;;  %v1022_v20 = vunpack.c.l.bf16 %v1080_v17 }
  0x34   : > { %1107 = vmatpush.bf16.msra.mxu3 %v1009_v44 }
  0x35   : > { %549 = vmatpush.msrb.mxu1 %v541_v21  ;;  %v1023_v21 = vunpack.c.h.bf16 %v1080_v17 }
  0x36   : > { %681 = vmatpush.bf16.msra.mxu0 %v1008_v46 }
  0x37   : > { %550 = vmatpush.msrb.mxu1 %v540_v22  ;;  %1108 = vmatpush.bf16.msra.mxu2 %v1008_v46  ;;  %v1030_v22 = vunpack.c.l.bf16 %v1082_v18 }
  0x38   : > { %1109 = vmatpush.bf16.msra.mxu3 %v1008_v46 }
  0x39   : > { %551 = vmatpush.msrb.mxu1 %v539_v23  ;;  %v1031_v23 = vunpack.c.h.bf16 %v1082_v18 }
  0x3b   : > { %552 = vmatpush.msrb.mxu1 %v538_v24  ;;  %v1042_v24 = vunpack.c.l.bf16 %v1085_v19 }
  0x3d   : > { %553 = vmatpush.msrb.mxu1 %v537_v25  ;;  %v1043_v25 = vunpack.c.h.bf16 %v1085_v19 }
  0x3f   : > { %554 = vmatpush.msrb.mxu1 %v536_v26 }
  0x41   : > { %555 = vmatpush.msrb.mxu1 %v535_v27 }
  0x43   : > { %556 = vmatpush.msrb.mxu1 %v534_v28 }
  0x45   : > { %557 = vmatpush.msrb.mxu1 %v533_v29 }
  0x47   : > { %558 = vmatpush.msrb.mxu1 %v532_v30 }
  0x49   : > { %559 = vmatpush.msrb.mxu1 %v531_v31 }
  0x4b   : > { %560 = vmatpush.msrb.mxu1 %v530_v32 }
  0x4d   : > { %561 = vmatpush.msrb.mxu1 %v529_v33 }
  0xab   : > { %v525_v35 = vpop.f32.mrf.mxu1 }
  0xac   : > { %v526_v36 = vadd.f32 %v525_v35, %v507_v34  ;;  %v1083_v35 = vld [vmem:[%s1429_s22 + $0x20] sm:$0xff]  }
  0xad   : > { %v1035_v38 = vunpack.c.h.bf16 %v1083_v35 }
  0xae   : > { %v528_v37 = vmax.f32 %v526_v36, 0.0  ;;  %v1086_v36 = vld [vmem:[%s1429_s22 + $0x38] sm:$0xff]  }
  0xaf   : > { %v1046_v39 = vunpack.c.l.bf16 %v1086_v36  ;;  %v1047_v40 = vunpack.c.h.bf16 %v1086_v36 }
  0xb0   : > { %562 = vmatmul.f32.vlgmr.msrb.gmra.mxu1 %v528_v37  ;;  %v1034_v37 = vunpack.c.l.bf16 %v1083_v35 }
 0x12d   : > { %v563_v47 = vpop.f32.mrf.mxu1 }
 0x12e   : > { %v564_v48 = vadd.f32 %v563_v47, %v545_v45  ;;  %v1449_v47 = vld [vmem:[%s1540_s7] ss:$0 sm:$0xff] }
 0x130   : > { %v973_v49 = vmul.f32 -1.442695, %v564_v48  ;;  %v1049_v48 = vld [vmem:[%s1444_s24] sm:$0xff]  }
 0x132   : > { %1152 = vpow2.f32 %v973_v49  ;;  %v1455_v49 = vld [vmem:[%s1541_s8] ss:$0 sm:$0xff] }
 0x138   : > { %v1153_v50 = vpop.eup %1152 }
 0x139   : > { %v569_v51 = vadd.f32 1.0, %v1153_v50 }
 0x13b   : > { %1154 = vrcp.f32 %v569_v51  ;;  %v581_v55 = vand.u32 2147483648, %v569_v51  ;;  %v579_v57 = vand.u32 2147483647, %v569_v51  ;;  %vm575_vm1 = vweird.f32 %v569_v51 }
 0x13d   : > { %v582_v62 = vor.u32 1.1754944e-38, %v581_v55  ;;  %vm580_vm3 = vcmp.eq.f32.partialorder %v579_v57, 8.507059e+37 }
 0x141   : > { %v1155_v52 = vpop.eup %1154 }
 0x142   : > { %v571_v53 = vmul.f32 %v1155_v52, %v569_v51  ;;  %vm576_vm0 = vweird.f32 %v1155_v52 }
 0x143   : > { %vm577_vm2 = vmor %vm575_vm1, %vm576_vm0 }
 0x144   : > { %v572_v54 = vsub.f32 1.0, %v571_v53 }
 0x146   : > { %v573_v56 = vmul.f32 %v1155_v52, %v572_v54  ;;  %v1088_v54 = vld [vmem:[%s1444_s24 + $0x10] sm:$0xff]  }
 0x147   : > { %v1058_v59 = vunpack.c.l.bf16 %v1088_v54 }
 0x148   : > { %v574_v60 = vadd.f32 %v1155_v52, %v573_v56  ;;  %v1091_v56 = vld [vmem:[%s1444_s24 + $0x28] sm:$0xff]  }
 0x14a   : > { %v578_v1 = vsel %vm577_vm2, %v1155_v52, %v574_v60  ;;  %v1050_v52 = vunpack.c.l.bf16 %v1049_v48 }
 0x14b   : > { %v583_v4 = vsel %vm580_vm3, %v582_v62, %v578_v1  ;;  %v1070_v62 = vunpack.c.l.bf16 %v1091_v56 }
 0x14c   : > { %v585_v7 = vperm.slane %v583_v4, 0 }
 0x14e   : > { %v586_v8 = vmul.f32 %v1018_v63, %v585_v7  ;;  %v587_v9 = vmul.f32 %v1019_v0, %v585_v7  ;;  %v590_v10 = vmul.f32 %v1026_v2, %v585_v7  ;;  %v591_v11 = vmul.f32 %v1027_v3, %v585_v7 }
 0x14f   : > { %v596_v12 = vmul.f32 %v1038_v5, %v585_v7  ;;  %v597_v13 = vmul.f32 %v1039_v6, %v585_v7  ;;  %v588_v26 = vmul.f32 %v1022_v20, %v585_v7  ;;  %v589_v27 = vmul.f32 %v1023_v21, %v585_v7 }
 0x150   : > { %v602_v14 = vpack.c.bf16 %v587_v9, %v586_v8  ;;  %v604_v15 = vpack.c.bf16 %v591_v11, %v590_v10  ;;  %v592_v28 = vmul.f32 %v1030_v22, %v585_v7  ;;  %v593_v29 = vmul.f32 %v1031_v23, %v585_v7  ;;  %v1087_v9 = vld [vmem:[%s1444_s24 + $0x8] sm:$0xff]   ;;  %v1089_v23 = vld [vmem:[%s1444_s24 + $0x18] sm:$0xff]  }
 0x151   : > { %v607_v16 = vpack.c.bf16 %v597_v13, %v596_v12  ;;  %v598_v30 = vmul.f32 %v1042_v24, %v585_v7  ;;  %v599_v31 = vmul.f32 %v1043_v25, %v585_v7  ;;  %v603_v32 = vpack.c.bf16 %v589_v27, %v588_v26  ;;  %v1092_v25 = vld [vmem:[%s1444_s24 + $0x30] sm:$0xff]  }
 0x152   : > { %682 = vmatmul.bf16.vlgmr.msra.gmra.mxu0 %v602_v14  ;;  %692 = vmatmul.bf16.vlgmr.msra.gmra.mxu2 %v604_v15  ;;  %v605_v33 = vpack.c.bf16 %v593_v29, %v592_v28  ;;  %v594_v41 = vmul.f32 %v1034_v37, %v585_v7  ;;  %v595_v42 = vmul.f32 %v1035_v38, %v585_v7  ;;  %v1051_v2 = vunpack.c.h.bf16 %v1049_v48 }
 0x153   : > { %707 = vmatmul.bf16.vlgmr.msra.gmra.mxu3 %v607_v16  ;;  %v608_v34 = vpack.c.bf16 %v599_v31, %v598_v30  ;;  %v600_v43 = vmul.f32 %v1046_v39, %v585_v7  ;;  %v601_v44 = vmul.f32 %v1047_v40, %v585_v7  ;;  %v1059_v11 = vunpack.c.h.bf16 %v1088_v54  ;;  %v1093_v54 = vld [vmem:[%s1444_s24 + $0x38] sm:$0xff]  }
 0x154   : > { %v606_v45 = vpack.c.bf16 %v595_v42, %v594_v41  ;;  %v1071_v14 = vunpack.c.h.bf16 %v1091_v56  ;;  %v1054_v18 = vunpack.c.l.bf16 %v1087_v9  ;;  %v1062_v28 = vunpack.c.l.bf16 %v1089_v23 }
 0x155   : > { %v609_v46 = vpack.c.bf16 %v601_v44, %v600_v43  ;;  %v1074_v31 = vunpack.c.l.bf16 %v1092_v25  ;;  %v1055_v35 = vunpack.c.h.bf16 %v1087_v9  ;;  %v1063_v43 = vunpack.c.h.bf16 %v1089_v23 }
 0x162   : > { %687 = vmatmul.bf16.gmra.mxu0 %v603_v32  ;;  %697 = vmatmul.bf16.gmra.mxu2 %v605_v33 }
 0x163   : > { %712 = vmatmul.bf16.gmra.mxu3 %v608_v34 }
 0x172   : > { %702 = vmatmul.bf16.gmra.mxu2 %v606_v45 }
 0x173   : > { %717 = vmatmul.bf16.gmra.mxu3 %v609_v46  ;;  %v1075_v46 = vunpack.c.h.bf16 %v1092_v25 }
 0x1cf   : > { %v683_v50 = vpop.f32.mrf.mxu0 }
 0x1d0   : > { %v727_v51 = vmul.f32 %v1449_v47, %v683_v50 }
 0x1d2   : > { %v747_v53 = vadd.f32 %v1455_v49, %v727_v51 }
 0x1d4   : > { %v795_v55 = vadd.f32 %v1050_v52, %v747_v53  ;;  %v1090_v53 = vld [vmem:[%s1444_s24 + $0x20] sm:$0xff]  }
 0x1d5   : > { %v693_v57 = vpop.f32.mrf.mxu2 }
 0x1d6   : > { %811 = vst [vmem:[%s1463_s20] sm:$0xff] %v795_v55  ;;  %v731_v58 = vmul.f32 %v1449_v47, %v693_v57  ;;  %v708_v60 = vpop.f32.mrf.mxu3  ;;  %v1066_v57 = vunpack.c.l.bf16 %v1090_v53 }
 0x1d7   : > { %v737_v61 = vmul.f32 %v1449_v47, %v708_v60  ;;  %v685_v63 = vpop.f32.mrf.mxu0  ;;  %v1078_v60 = vunpack.c.l.bf16 %v1093_v54 }
 0x1d8   : > { %v751_v0 = vadd.f32 %v1455_v49, %v731_v58  ;;  %v728_v1 = vmul.f32 %v1449_v47, %v685_v63 }
 0x1d9   : > { %v757_v3 = vadd.f32 %v1455_v49, %v737_v61 }
 0x1da   : > { %v799_v4 = vadd.f32 %v1058_v59, %v751_v0  ;;  %v748_v5 = vadd.f32 %v1455_v49, %v728_v1 }
 0x1db   : > { %v805_v6 = vadd.f32 %v1070_v62, %v757_v3  ;;  %v1067_v3 = vunpack.c.h.bf16 %v1090_v53 }
 0x1dc   : > { %815 = vst [vmem:[%s1463_s20 + $0x20] sm:$0xff] %v799_v4  ;;  %v796_v7 = vadd.f32 %v1051_v2, %v748_v5 }
 0x1dd   : > { %821 = vst [vmem:[%s1463_s20 + $0x50] sm:$0xff] %v805_v6  ;;  %v695_v8 = vpop.f32.mrf.mxu2  ;;  %v1079_v6 = vunpack.c.h.bf16 %v1093_v54 }
 0x1de   : > { %812 = vst [vmem:[%s1463_s20 + $0x8] sm:$0xff] %v796_v7  ;;  %v732_v10 = vmul.f32 %v1449_v47, %v695_v8  ;;  %v710_v12 = vpop.f32.mrf.mxu3 }
 0x1df   : > { %v738_v13 = vmul.f32 %v1449_v47, %v710_v12  ;;  %v688_v15 = vpop.f32.mrf.mxu0 }
 0x1e0   : > { %v752_v16 = vadd.f32 %v1455_v49, %v732_v10  ;;  %v729_v17 = vmul.f32 %v1449_v47, %v688_v15 }
 0x1e1   : > { %v758_v19 = vadd.f32 %v1455_v49, %v738_v13 }
 0x1e2   : > { %v800_v20 = vadd.f32 %v1059_v11, %v752_v16  ;;  %v749_v21 = vadd.f32 %v1455_v49, %v729_v17 }
 0x1e3   : > { %v806_v22 = vadd.f32 %v1071_v14, %v758_v19 }
 0x1e4   : > { %816 = vst [vmem:[%s1463_s20 + $0x28] sm:$0xff] %v800_v20  ;;  %v797_v24 = vadd.f32 %v1054_v18, %v749_v21 }
 0x1e5   : > { %822 = vst [vmem:[%s1463_s20 + $0x58] sm:$0xff] %v806_v22  ;;  %v698_v26 = vpop.f32.mrf.mxu2 }
 0x1e6   : > { %813 = vst [vmem:[%s1463_s20 + $0x10] sm:$0xff] %v797_v24  ;;  %v733_v27 = vmul.f32 %v1449_v47, %v698_v26  ;;  %v713_v29 = vpop.f32.mrf.mxu3 }
 0x1e7   : > { %v739_v30 = vmul.f32 %v1449_v47, %v713_v29  ;;  %v690_v32 = vpop.f32.mrf.mxu0 }
 0x1e8   : > { %v753_v33 = vadd.f32 %v1455_v49, %v733_v27  ;;  %v730_v34 = vmul.f32 %v1449_v47, %v690_v32 }
 0x1e9   : > { %v759_v36 = vadd.f32 %v1455_v49, %v739_v30 }
 0x1ea   : > { %v801_v37 = vadd.f32 %v1062_v28, %v753_v33  ;;  %v750_v38 = vadd.f32 %v1455_v49, %v730_v34 }
 0x1eb   : > { %v807_v39 = vadd.f32 %v1074_v31, %v759_v36 }
 0x1ec   : > { %817 = vst [vmem:[%s1463_s20 + $0x30] sm:$0xff] %v801_v37  ;;  %v798_v40 = vadd.f32 %v1055_v35, %v750_v38 }
 0x1ed   : > { %823 = vst [vmem:[%s1463_s20 + $0x60] sm:$0xff] %v807_v39  ;;  %v700_v41 = vpop.f32.mrf.mxu2 }
 0x1ee   : > { %814 = vst [vmem:[%s1463_s20 + $0x18] sm:$0xff] %v798_v40  ;;  %v734_v42 = vmul.f32 %v1449_v47, %v700_v41  ;;  %v715_v44 = vpop.f32.mrf.mxu3 }
 0x1ef   : > { %v740_v45 = vmul.f32 %v1449_v47, %v715_v44 }
 0x1f0   : > { %v754_v48 = vadd.f32 %v1455_v49, %v734_v42 }
 0x1f1   : > { %v760_v50 = vadd.f32 %v1455_v49, %v740_v45 }
 0x1f2   : > { %v802_v51 = vadd.f32 %v1063_v43, %v754_v48 }
 0x1f3   : > { %v808_v52 = vadd.f32 %v1075_v46, %v760_v50 }
 0x1f4   : > { %818 = vst [vmem:[%s1463_s20 + $0x38] sm:$0xff] %v802_v51 }
 0x1f5   : > { %824 = vst [vmem:[%s1463_s20 + $0x68] sm:$0xff] %v808_v52  ;;  %v703_v55 = vpop.f32.mrf.mxu2 }
 0x1f6   : > { %v735_v56 = vmul.f32 %v1449_v47, %v703_v55  ;;  %v718_v58 = vpop.f32.mrf.mxu3 }
 0x1f7   : > { %v741_v59 = vmul.f32 %v1449_v47, %v718_v58 }
 0x1f8   : > { %v755_v61 = vadd.f32 %v1455_v49, %v735_v56 }
 0x1f9   : > { %v761_v62 = vadd.f32 %v1455_v49, %v741_v59 }
 0x1fa   : > { %v803_v63 = vadd.f32 %v1066_v57, %v755_v61 }
 0x1fb   : > { %v809_v0 = vadd.f32 %v1078_v60, %v761_v62 }
 0x1fc   : > { %819 = vst [vmem:[%s1463_s20 + $0x40] sm:$0xff] %v803_v63 }
 0x1fd   : > { %825 = vst [vmem:[%s1463_s20 + $0x70] sm:$0xff] %v809_v0  ;;  %v705_v1 = vpop.f32.mrf.mxu2 }
 0x1fe   : > { %v736_v2 = vmul.f32 %v1449_v47, %v705_v1  ;;  %v720_v4 = vpop.f32.mrf.mxu3 }
 0x1ff   : > { %v742_v5 = vmul.f32 %v1449_v47, %v720_v4 }
 0x200   : > { %v756_v7 = vadd.f32 %v1455_v49, %v736_v2 }
 0x201   : > { %v762_v8 = vadd.f32 %v1455_v49, %v742_v5 }
 0x202   : > { %v804_v9 = vadd.f32 %v1067_v3, %v756_v7 }
 0x203   : > { %v810_v10 = vadd.f32 %v1079_v6, %v762_v8 }
 0x204   : > { %820 = vst [vmem:[%s1463_s20 + $0x48] sm:$0xff] %v804_v9 }
 0x205   : > { %826 = vst [vmem:[%s1463_s20 + $0x78] sm:$0xff] %v810_v10 }
 0x206 PF: > { %s20_s17 = sadd.s32 1, %s1194_s17   ;;  %s1544_s13 = smov %s1186_s15 }
 0x207   : > { %p17_p7 = scmp.ge.s32.totalorder %s20_s17, 6   ;;  %s1545_s14 = smov %s1190_s16 }
 0x208   : > { %s1546_s15 = smov %s1549_s18  ;;  %s1547_s16 = smov %s1553_s19 }
 0x209   :  { %19 = sbr.rel (!%p17_p7) target bundleno = 3 (0x3), region = 96 }

// kernel: mbconv_forward.2
= control target key start
LH: loop header
LB: loop body
LE: loop exit
PB: predicated region body
PF: predicated region fallthrough
CT: control target
= control target key end

     0   :  { %s2379_s27 = smov 0   ;;  %s2381_s28 = smov 0   ;;  %s3831_s0 = inlined_call_operand.vmem [shape: bf16[2,18,32,128], index: 0, kind: input, shape index: {}]   ;;  %s3832_s1 = inlined_call_operand.vmem [shape: bf16[128,128], index: 1, kind: input, shape index: {}]   ;;  %s3833_s2 = inlined_call_operand.vmem [shape: f32[1,128], index: 2, kind: input, shape index: {}]   ;;  %s3834_s3 = inlined_call_operand.vmem [shape: f32[1,128], index: 3, kind: input, shape index: {}]   ;;  %s3835_s4 = inlined_call_operand.vmem [shape: f32[9,128], index: 4, kind: input, shape index: {}]   ;;  %s3836_s5 = inlined_call_operand.vmem [shape: f32[1,128], index: 5, kind: input, shape index: {}]   ;;  %s3837_s6 = inlined_call_operand.vmem [shape: f32[1,128], index: 6, kind: input, shape index: {}]   ;;  %s3838_s7 = inlined_call_operand.vmem [shape: bf16[2,16,16,128], index: 7, kind: output, shape index: {0}]   ;;  %s3839_s8 = inlined_call_operand.vmem [shape: f32[2,1,128], index: 8, kind: output, shape index: {1}]  }
   0x1   :  { %s2383_s29 = smov 0   ;;  %s2385_s30 = smov 0  }
   0x2   :  { %s2387_s9 = smov 0  }
   0x3 LB: > { %s28_s10 = sadd.s32 1, %s2323_s29  ;;  %s31_s11 = sadd.s32 1, %s2327_s30  ;;  %s2331_s9 = sphi %s2387_s9, %s19_s9   ;;  %s2327_s30 = sphi %s2385_s30, %s4077_s30   ;;  %s2323_s29 = sphi %s2383_s29, %s4076_s29   ;;  %s2319_s28 = sphi %s2381_s28, %s4075_s28   ;;  %s2315_s27 = sphi %s2379_s27, %s4074_s27  }
   0x4   : > { %p29_p0 = scmp.ge.s32.totalorder %s28_s10, 2  ;;  %p2018_p1 = scmp.ge.s32.totalorder %s2331_s9, 1 }
   0x5   : > { %p279_p2 = scmp.lt.s32.totalorder %s2331_s9, 5 }
   0x6   : > { %s4079_s10 = smov (%p29_p0, %s28_s10), 0  ;;  %s4081_s11 = smov (!%p29_p0, %s31_s11), %s2327_s30 }
   0x7   : > { %p280_p3 = pnand %p2018_p1, %p279_p2  ;;  %p33_p4 = scmp.ge.s32.totalorder %s4081_s11, 2 }
   0x9   : > { %s4083_s11 = smov (%p33_p4, %s4081_s11), 0  ;;  %283 = sbr.rel (%p280_p3) target bundleno = 433 (0x1b1), region = 48 }
   0xa   : > { %3866 = sst [smem:[#allocation2_spill]] %s4083_s11 }
   0xe   : > { %p321_p5 = scmp.lt.s32.totalorder %s2319_s28, 1  ;;  %s2412_s12 = sshll.u32 %s2315_s27, 3 }
   0xf   : > { %p329_p6 = scmp.lt.s32.totalorder %s2412_s12, 15  ;;  %p2024_p7 = scmp.ne.s32.totalorder %s2315_s27, 0 }
  0x10   : > { %s4085_s28 = smov (!%p321_p5, %s2319_s28), 1 }
  0x11   : > { %s330_s13 = scalar_select %p329_p6, %s2412_s12, 15 }
  0x12   : > { %s2243_s14 = smul.u32 288, %s4085_s28  ;;  %s2022_s15 = sshll.u32 %s4085_s28, 5 }
  0x13   : > { %s2021_s16 = sshll.u32 %s330_s13, 1  ;;  %s2419_s19 = scalar_lea.vmem %s3839_s8, %s4085_s28 }
  0x14   : > { %s2424_s22 = scalar_lea.vmem %s3831_s0, %s2243_s14  ;;  %s333_s23 = sadd.s32 %s2022_s15, %s2021_s16 }
  0x15   : > { %s2023_s24 = sshll.u32 %s333_s23, 2  ;;  %343 = sbr.rel (%p2024_p7) target bundleno = 28 (0x1c), region = 52 }
  0x16   : > { %s2429_s11 = scalar_lea.vmem %s3838_s7, %s2023_s24 }
  0x1a   : > { %v2333_v0 = vmov 0.0  }
  0x1b   : > { %344 = vst [vmem:[%s2419_s19] sm:$0x1] %v2333_v0 }
  0x1c PF: > { %v2171_v1 = vld [vmem:[%s3832_s1 + $0x38] sm:$0xff]  ;;  %v2170_v2 = vld [vmem:[%s3832_s1 + $0x30] sm:$0xff]  ;;  %v2169_v3 = vld [vmem:[%s3832_s1 + $0x28] sm:$0xff]  ;;  %s2143_s13 = sshll.u32 %s2315_s27, 7  ;;  %v810_v30 = vlaneseq  ;;  %v2492_v32 = vstv %s2412_s12  ;;  %vm1024_vm14 = vcmask 1046528   ;;  %vm1146_vm15 = vcmask 1045504  }
  0x1d   : > { %573 = vmatpush.bf16.msra.mxu0 %v2171_v1  ;;  %2219 = vmatpush.bf16.msra.mxu1 %v2171_v1  ;;  %v2168_v4 = vld [vmem:[%s3832_s1 + $0x20] sm:$0xff]  ;;  %v2167_v5 = vld [vmem:[%s3832_s1 + $0x18] sm:$0xff]  ;;  %v2166_v6 = vld [vmem:[%s3832_s1 + $0x10] sm:$0xff]  ;;  %s2459_s16 = scalar_lea.vmem %s2424_s22, %s2143_s13  ;;  %3867 = vst [vmem:[#allocation3_spill] sm:$0xff] %v2492_v32  ;;  %v802_v35 = vadd.s32 2, %v2492_v32  ;;  %vm814_vm0 = vcmp.ge.s32.totalorder %v2492_v32, 1 }
  0x1e   : > { %2220 = vmatpush.bf16.msra.mxu2 %v2171_v1  ;;  %2221 = vmatpush.bf16.msra.mxu3 %v2171_v1  ;;  %v2165_v7 = vld [vmem:[%s3832_s1 + $0x8] sm:$0xff]  ;;  %v2164_v8 = vld [vmem:[%s3832_s1] sm:$0xff]  ;;  %v2154_v11 = vld [vmem:[%s2459_s16 + $0x50] sm:$0xff]  ;;  %v2497_v38 = vshrl.u32 %v810_v30, 7  ;;  %vm824_vm1 = vcmp.le.s32.totalorder %v2492_v32, 16  ;;  %v805_v47 = vadd.s32 5, %v2492_v32 }
  0x1f   : > { %v2144_v9 = vld [vmem:[%s2459_s16] sm:$0xff]  ;;  %v2149_v10 = vld [vmem:[%s2459_s16 + $0x28] sm:$0xff]  ;;  %v2159_v12 = vld [vmem:[%s2459_s16 + $0x78] sm:$0xff]  ;;  %vm816_vm2 = vcmp.ge.s32.totalorder %v802_v35, 1  ;;  %vm826_vm3 = vcmp.le.s32.totalorder %v802_v35, 16 }
  0x20   : > { %v2145_v13 = vld [vmem:[%s2459_s16 + $0x8] sm:$0xff]  ;;  %v2150_v14 = vld [vmem:[%s2459_s16 + $0x30] sm:$0xff]  ;;  %v2155_v15 = vld [vmem:[%s2459_s16 + $0x58] sm:$0xff]  ;;  %v2504_v43 = vadd.s32 16, %v2497_v38  ;;  %vm844_vm5 = vcmp.ge.s32.totalorder %v2497_v38, 1  ;;  %vm819_vm10 = vcmp.ge.s32.totalorder %v805_v47, 1 }
  0x21   : > { %574 = vmatpush.bf16.msra.mxu0 %v2170_v2  ;;  %2222 = vmatpush.bf16.msra.mxu1 %v2170_v2  ;;  %v2160_v16 = vld [vmem:[%s2459_s16 + $0x80] sm:$0xff]  ;;  %v2146_v17 = vld [vmem:[%s2459_s16 + $0x10] sm:$0xff]  ;;  %v2151_v18 = vld [vmem:[%s2459_s16 + $0x38] sm:$0xff]  ;;  %vm829_vm11 = vcmp.le.s32.totalorder %v805_v47, 16 }
  0x22   : > { %2223 = vmatpush.bf16.msra.mxu2 %v2170_v2  ;;  %2224 = vmatpush.bf16.msra.mxu3 %v2170_v2  ;;  %v2156_v19 = vld [vmem:[%s2459_s16 + $0x60] sm:$0xff]  ;;  %v2161_v20 = vld [vmem:[%s2459_s16 + $0x88] sm:$0xff]  ;;  %v2147_v21 = vld [vmem:[%s2459_s16 + $0x18] sm:$0xff]  ;;  %3868 = vst [vmem:[#allocation4_spill] sm:$0xff] %v2504_v43  ;;  %vm879_vm8 = vcmp.le.s32.totalorder %v2504_v43, 16 }
  0x23   : > { %v2152_v22 = vld [vmem:[%s2459_s16 + $0x40] sm:$0xff]  ;;  %v2157_v23 = vld [vmem:[%s2459_s16 + $0x68] sm:$0xff]  ;;  %v2162_v24 = vld [vmem:[%s2459_s16 + $0x90] sm:$0xff] }
  0x24   : > { %v2148_v25 = vld [vmem:[%s2459_s16 + $0x20] sm:$0xff]  ;;  %v2153_v26 = vld [vmem:[%s2459_s16 + $0x48] sm:$0xff]  ;;  %v2158_v27 = vld [vmem:[%s2459_s16 + $0x70] sm:$0xff] }
  0x25   : > { %575 = vmatpush.bf16.msra.mxu0 %v2169_v3  ;;  %2225 = vmatpush.bf16.msra.mxu1 %v2169_v3  ;;  %v2163_v28 = vld [vmem:[%s2459_s16 + $0x98] sm:$0xff]  ;;  %v2484_v29 = vld [vmem:[%s3833_s2] ss:$0 sm:$0xff]  ;;  %vm2506_vm4 = vmand %vm814_vm0, %vm824_vm1 }
  0x26   : > { %2226 = vmatpush.bf16.msra.mxu2 %v2169_v3  ;;  %2227 = vmatpush.bf16.msra.mxu3 %v2169_v3  ;;  %v2489_v31 = vld [vmem:[%s3834_s3] ss:$0 sm:$0xff]  ;;  %vm2511_vm6 = vmand %vm816_vm2, %vm826_vm3 }
  0x27   : > { %v940_v49 = vld [vmem:[%s3835_s4] sm:$0xff]  ;;  %vm847_vm7 = vmand %vm2506_vm4, %vm844_vm5 }
  0x28   : > { %vm888_vm9 = vmand %vm2511_vm6, %vm879_vm8  ;;  %v2530_v56 = vperm.slane %v940_v49, 1  ;;  %v2532_v57 = vperm.slane %v940_v49, 2  ;;  %v2534_v59 = vperm.slane %v940_v49, 0  ;;  %v2536_v61 = vperm.slane %v940_v49, 4 }
  0x29   : > { %576 = vmatpush.bf16.msra.mxu0 %v2168_v4  ;;  %2228 = vmatpush.bf16.msra.mxu1 %v2168_v4  ;;  %v2538_v62 = vperm.slane %v940_v49, 5  ;;  %v2540_v63 = vperm.slane %v940_v49, 7  ;;  %vm2543_vm12 = vmand %vm819_vm10, %vm829_vm11  ;;  %v2547_v2 = vperm.slane %v940_v49, 3 }
  0x2a   : > { %2229 = vmatpush.bf16.msra.mxu2 %v2168_v4  ;;  %2230 = vmatpush.bf16.msra.mxu3 %v2168_v4  ;;  %vm2581_vm13 = vmand %vm2543_vm12, %vm844_vm5 }
  0x2b   : > { %vm882_vm3 = vmand %vm2506_vm4, %vm879_vm8 }
  0x2d   : > { %577 = vmatpush.bf16.msra.mxu0 %v2167_v5  ;;  %2231 = vmatpush.bf16.msra.mxu1 %v2167_v5 }
  0x2e   : > { %2232 = vmatpush.bf16.msra.mxu2 %v2167_v5  ;;  %2233 = vmatpush.bf16.msra.mxu3 %v2167_v5 }
  0x31   : > { %578 = vmatpush.bf16.msra.mxu0 %v2166_v6  ;;  %2234 = vmatpush.bf16.msra.mxu1 %v2166_v6 }
  0x32   : > { %2235 = vmatpush.bf16.msra.mxu2 %v2166_v6  ;;  %2236 = vmatpush.bf16.msra.mxu3 %v2166_v6  ;;  %v2556_v6 = vperm.slane %v940_v49, 6 }
  0x35   : > { %579 = vmatpush.bf16.msra.mxu0 %v2165_v7  ;;  %2237 = vmatpush.bf16.msra.mxu1 %v2165_v7 }
  0x36   : > { %2238 = vmatpush.bf16.msra.mxu2 %v2165_v7  ;;  %2239 = vmatpush.bf16.msra.mxu3 %v2165_v7 }
  0x39   : > { %580 = vmatpush.bf16.msra.mxu0 %v2164_v8  ;;  %2240 = vmatpush.bf16.msra.mxu1 %v2164_v8 }
  0x3a   : > { %2241 = vmatpush.bf16.msra.mxu2 %v2164_v8  ;;  %2242 = vmatpush.bf16.msra.mxu3 %v2164_v8  ;;  %v803_v8 = vadd.s32 3, %v2492_v32 }
  0x3c   : > { %581 = vmatmul.bf16.vlgmr.msra.gmra.mxu0 %v2144_v9  ;;  %604 = vmatmul.bf16.vlgmr.msra.gmra.mxu1 %v2149_v10  ;;  %vm817_vm0 = vcmp.ge.s32.totalorder %v803_v8, 1  ;;  %vm827_vm1 = vcmp.le.s32.totalorder %v803_v8, 16 }
  0x3d   : > { %626 = vmatmul.bf16.vlgmr.msra.gmra.mxu2 %v2154_v11  ;;  %649 = vmatmul.bf16.vlgmr.msra.gmra.mxu3 %v2159_v12  ;;  %vm2637_vm2 = vmand %vm817_vm0, %vm827_vm1 }
  0x4c   : > { %586 = vmatmul.bf16.gmra.mxu0 %v2145_v13  ;;  %608 = vmatmul.bf16.gmra.mxu1 %v2150_v14 }
  0x4d   : > { %631 = vmatmul.bf16.gmra.mxu2 %v2155_v15  ;;  %653 = vmatmul.bf16.gmra.mxu3 %v2160_v16 }
  0x5c   : > { %590 = vmatmul.bf16.gmra.mxu0 %v2146_v17  ;;  %613 = vmatmul.bf16.gmra.mxu1 %v2151_v18  ;;  %v2575_v18 = vld [vmem:[%s3835_s4 + $0x8] ss:$0 sm:$0xff] }
  0x5d   : > { %635 = vmatmul.bf16.gmra.mxu2 %v2156_v19  ;;  %658 = vmatmul.bf16.gmra.mxu3 %v2161_v20 }
  0x6c   : > { %595 = vmatmul.bf16.gmra.mxu0 %v2147_v21  ;;  %617 = vmatmul.bf16.gmra.mxu1 %v2152_v22 }
  0x6d   : > { %640 = vmatmul.bf16.gmra.mxu2 %v2157_v23  ;;  %662 = vmatmul.bf16.gmra.mxu3 %v2162_v24 }
  0x7c   : > { %599 = vmatmul.bf16.gmra.mxu0 %v2148_v25  ;;  %622 = vmatmul.bf16.gmra.mxu1 %v2153_v26 }
  0x7d   : > { %644 = vmatmul.bf16.gmra.mxu2 %v2158_v27  ;;  %667 = vmatmul.bf16.gmra.mxu3 %v2163_v28 }
  0xb9   : > { %v582_v33 = vpop.f32.mrf.mxu0  ;;  %v605_v34 = vpop.f32.mrf.mxu1 }
  0xba   : > { %v676_v36 = vmul.f32 %v2484_v29, %v582_v33  ;;  %v684_v37 = vmul.f32 %v2484_v29, %v605_v34 }
  0xbc   : > { %v710_v39 = vadd.f32 %v2489_v31, %v676_v36  ;;  %v718_v40 = vadd.f32 %v2489_v31, %v684_v37 }
  0xbe   : > { %v740_v41 = vmax.f32 %v710_v39, 0.0  ;;  %v748_v42 = vmax.f32 %v718_v40, 0.0 }
  0xc0   : > { %v627_v46 = vpop.f32.mrf.mxu2  ;;  %v770_v48 = vmin.f32 %v740_v41, 6.0  ;;  %v778_v52 = vmin.f32 %v748_v42, 6.0  ;;  %v650_v53 = vpop.f32.mrf.mxu3 }
  0xc1   : > { %v584_v50 = vpop.f32.mrf.mxu0  ;;  %v607_v51 = vpop.f32.mrf.mxu1  ;;  %v691_v54 = vmul.f32 %v2484_v29, %v627_v46 }
  0xc2   : > { %v677_v55 = vmul.f32 %v2484_v29, %v584_v50  ;;  %v910_v58 = vsel %vm847_vm7, %v770_v48, 0.0  ;;  %v918_v60 = vsel %vm888_vm9, %v778_v52, 0.0  ;;  %v699_v50 = vmul.f32 %v2484_v29, %v650_v53  ;;  %vm897_vm7 = vmand %vm2543_vm12, %vm879_vm8 }
  0xc3   : > { %v725_v0 = vadd.f32 %v2489_v31, %v691_v54  ;;  %v2551_v4 = vmul.f32 %v2530_v56, %v910_v58  ;;  %v2554_v5 = vmul.f32 %v2532_v57, %v910_v58  ;;  %v2560_v9 = vmul.f32 %v2530_v56, %v918_v60 }
  0xc4   : > { %v711_v3 = vadd.f32 %v2489_v31, %v677_v55  ;;  %v2564_v15 = vmul.f32 %v2532_v57, %v918_v60  ;;  %v2567_v16 = vmul.f32 %v2536_v61, %v918_v60  ;;  %v2570_v17 = vmul.f32 %v2538_v62, %v918_v60 }
  0xc5   : > { %3875 = vst [vmem:[#allocation5_spill] sm:$0xff] %v2560_v9  ;;  %v755_v10 = vmax.f32 %v725_v0, 0.0  ;;  %v943_v26 = vmul.f32 %v2534_v59, %v910_v58  ;;  %v2590_v27 = vmul.f32 %v2540_v63, %v918_v60  ;;  %v1025_v28 = vrot.slane %v2551_v4, 1 }
  0xc6   : > { %v741_v11 = vmax.f32 %v711_v3, 0.0  ;;  %3876 = vst [vmem:[#allocation6_spill] sm:$0xff] %v2564_v15  ;;  %v1147_v30 = vrot.slane %v2554_v5, 2  ;;  %v2600_v35 = vmul.f32 %v2575_v18, %v918_v60  ;;  %v2616_v51 = vadd.s32 7, %v2492_v32 }
  0xc7   : > { %3877 = vst [vmem:[#allocation7_spill] sm:$0xff] %v2567_v16  ;;  %v785_v22 = vmin.f32 %v755_v10, 6.0  ;;  %v2628_v0 = vadd.s32 1, %v2492_v32 }
  0xc8   : > { %v629_v7 = vpop.f32.mrf.mxu2  ;;  %3878 = vst [vmem:[#allocation8_spill] sm:$0xff] %v2570_v17  ;;  %v652_v21 = vpop.f32.mrf.mxu3  ;;  %v771_v23 = vmin.f32 %v741_v11, 6.0  ;;  %vm821_vm9 = vcmp.ge.s32.totalorder %v2616_v51, 1  ;;  %vm831_vm10 = vcmp.le.s32.totalorder %v2616_v51, 16 }
  0xc9   : > { %v692_v12 = vmul.f32 %v2484_v29, %v629_v7  ;;  %v587_v13 = vpop.f32.mrf.mxu0  ;;  %v609_v14 = vpop.f32.mrf.mxu1  ;;  %3881 = vst [vmem:[#allocation9_spill] sm:$0xff] %v2590_v27  ;;  %v2597_v34 = vsel %vm2581_vm13, %v785_v22, 0.0  ;;  %vm2780_vm11 = vmand %vm821_vm9, %vm831_vm10  ;;  %vm825_vm0 = vcmp.le.s32.totalorder %v2628_v0, 16 }
  0xca   : > { %v678_v20 = vmul.f32 %v2484_v29, %v587_v13  ;;  %v685_v25 = vmul.f32 %v2484_v29, %v609_v14  ;;  %3882 = vst [vmem:[#allocation10_spill] sm:$0xff] %v2600_v35  ;;  %v911_v36 = vsel %vm2506_vm4, %v771_v23, 0.0  ;;  %v2612_v48 = vmul.f32 %v2530_v56, %v2597_v34  ;;  %vm856_vm4 = vmand %vm2637_vm2, %vm844_vm5 }
  0xcb   : > { %v726_v24 = vadd.f32 %v2489_v31, %v692_v12  ;;  %v2620_v52 = vmul.f32 %v2534_v59, %v2597_v34  ;;  %v2624_v54 = vmul.f32 %v2532_v57, %v2597_v34  ;;  %v977_v55 = vmul.f32 %v2530_v56, %v911_v36  ;;  %vm2795_vm13 = vmand %vm2780_vm11, %vm879_vm8 }
  0xcc   : > { %v712_v39 = vadd.f32 %v2489_v31, %v678_v20  ;;  %v719_v46 = vadd.f32 %v2489_v31, %v685_v25  ;;  %v2632_v53 = vmul.f32 %v2536_v61, %v2597_v34  ;;  %v1099_v3 = vmul.f32 %v2532_v57, %v911_v36 }
  0xcd   : > { %v756_v37 = vmax.f32 %v726_v24, 0.0  ;;  %v2643_v10 = vmul.f32 %v2538_v62, %v2597_v34  ;;  %v1026_v11 = vrot.slane %v977_v55, 1  ;;  %v1050_v14 = vrot.slane %v2612_v48, 1 }
  0xce   : > { %v742_v5 = vmax.f32 %v712_v39, 0.0  ;;  %v749_v12 = vmax.f32 %v719_v46, 0.0  ;;  %v2653_v8 = vmul.f32 %v2540_v63, %v2597_v34  ;;  %v1148_v19 = vrot.slane %v1099_v3, 2 }
  0xcf   : > { %v786_v4 = vmin.f32 %v756_v37, 6.0  ;;  %v2657_v21 = vmul.f32 %v2575_v18, %v2597_v34  ;;  %v1027_v22 = vsel %vm1024_vm14, %v1025_v28, %v1026_v11  ;;  %v1172_v46 = vrot.slane %v2624_v54, 2 }
  0xd0   : > { %v632_v49 = vpop.f32.mrf.mxu2  ;;  %v772_v20 = vmin.f32 %v742_v5, 6.0  ;;  %v779_v23 = vmin.f32 %v749_v12, 6.0  ;;  %v1081_v24 = vadd.f32 %v1027_v22, %v943_v26  ;;  %v1149_v25 = vsel %vm1146_vm15, %v1147_v30, %v1148_v19 }
  0xd1   : > { %v589_v58 = vpop.f32.mrf.mxu0  ;;  %v611_v60 = vpop.f32.mrf.mxu1  ;;  %v693_v13 = vmul.f32 %v2484_v29, %v632_v49  ;;  %v2668_v37 = vsel %vm2543_vm12, %v786_v4, 0.0  ;;  %v944_v28 = vmul.f32 %v2534_v59, %v911_v36  ;;  %v1321_v55 = vrot.slane %v2632_v53, 1 }
  0xd2   : > { %v912_v39 = vsel %vm882_vm3, %v772_v20, 0.0  ;;  %v2675_v58 = vadd.f32 %v1149_v25, %v1081_v24  ;;  %v2677_v26 = vsel %vm856_vm4, %v779_v23, 0.0  ;;  %v1442_v4 = vrot.slane %v2643_v10, 2  ;;  %vm891_vm4 = vmand %vm2637_vm2, %vm879_vm8 }
  0xd3   : > { %v727_v44 = vadd.f32 %v2489_v31, %v693_v13  ;;  %v978_v48 = vmul.f32 %v2530_v56, %v912_v39  ;;  %v1100_v49 = vmul.f32 %v2532_v57, %v912_v39  ;;  %v992_v54 = vmul.f32 %v2530_v56, %v2668_v37 }
  0xd4   : > { %v1591_v20 = vrot.slane %v2653_v8, 1  ;;  %v686_v22 = vmul.f32 %v2484_v29, %v611_v60  ;;  %v733_v23 = vadd.f32 %v2489_v31, %v699_v50  ;;  %v2694_v24 = vmul.f32 %v2530_v56, %v2677_v26 }
  0xd5   : > { %v757_v30 = vmax.f32 %v727_v44, 0.0  ;;  %v1028_v5 = vrot.slane %v978_v48, 1  ;;  %v1150_v12 = vrot.slane %v1100_v49, 2  ;;  %v954_v8 = vmul.f32 %v2534_v59, %v2668_v37 }
  0xd6   : > { %v2704_v50 = vmul.f32 %v2532_v57, %v2677_v26  ;;  %v2708_v60 = vmul.f32 %v2536_v61, %v2677_v26  ;;  %v1051_v39 = vrot.slane %v992_v54, 1  ;;  %v1114_v1 = vmul.f32 %v2532_v57, %v2668_v37 }
  0xd7   : > { %v1029_v44 = vsel %vm1024_vm14, %v1026_v11, %v1028_v5  ;;  %v1151_v10 = vsel %vm1146_vm15, %v1148_v19, %v1150_v12  ;;  %v787_v11 = vmin.f32 %v757_v30, 6.0  ;;  %v2712_v19 = vmul.f32 %v2538_v62, %v2677_v26 }
  0xd8   : > { %v634_v3 = vpop.f32.mrf.mxu2  ;;  %v1082_v25 = vadd.f32 %v1029_v44, %v944_v28  ;;  %v1266_v28 = vmul.f32 %v2536_v61, %v2668_v37  ;;  %v2722_v49 = vmul.f32 %v2540_v63, %v2677_v26  ;;  %v1387_v30 = vmul.f32 %v2538_v62, %v2668_v37 }
  0xd9   : > { %v2682_v36 = vpop.f32.mrf.mxu0  ;;  %v2684_v13 = vpop.f32.mrf.mxu1  ;;  %v927_v3 = vsel %vm897_vm7, %v787_v11, 0.0  ;;  %v1052_v12 = vsel %vm1024_vm14, %v1050_v14, %v1051_v39  ;;  %v1173_v44 = vrot.slane %v1114_v1, 2  ;;  %vm815_vm12 = vcmp.ge.s32.totalorder %v2628_v0, 1 }
  0xda   : > { %v2718_v48 = vadd.f32 %v1151_v10, %v1082_v25  ;;  %v993_v5 = vmul.f32 %v2530_v56, %v927_v3  ;;  %v1115_v54 = vmul.f32 %v2532_v57, %v927_v3  ;;  %v1091_v47 = vadd.f32 %v1052_v12, %v2620_v52  ;;  %vm2828_vm1 = vmand %vm815_vm12, %vm825_vm0 }
  0xdb   : > { %v1267_v10 = vmul.f32 %v2536_v61, %v927_v3  ;;  %v1322_v25 = vrot.slane %v1266_v28, 1  ;;  %v1388_v42 = vmul.f32 %v2538_v62, %v927_v3  ;;  %v1174_v40 = vsel %vm1146_vm15, %v1172_v46, %v1173_v44  ;;  %vm850_vm3 = vmand %vm2828_vm1, %vm844_vm5 }
  0xdc   : > { %v1053_v11 = vrot.slane %v993_v5, 1  ;;  %v1175_v33 = vrot.slane %v1115_v54, 2  ;;  %v1443_v53 = vrot.slane %v1387_v30, 2  ;;  %v2737_v17 = vadd.f32 %v1174_v40, %v1091_v47 }
  0xdd   : > { %v2740_v1 = vsel %vm1024_vm14, %v1321_v55, %v1322_v25  ;;  %v1324_v52 = vrot.slane %v1267_v10, 1  ;;  %v1445_v12 = vrot.slane %v1388_v42, 2  ;;  %v1538_v46 = vmul.f32 %v2540_v63, %v2668_v37 }
  0xde   : > { %3885 = vst [vmem:[#allocation11_spill] sm:$0xff] %v2740_v1  ;;  %v1054_v28 = vsel %vm1024_vm14, %v1051_v39, %v1053_v11  ;;  %v1176_v16 = vsel %vm1146_vm15, %v1173_v44, %v1175_v33  ;;  %v2745_v5 = vsel %vm1146_vm15, %v1442_v4, %v1443_v53  ;;  %v1539_v47 = vmul.f32 %v2540_v63, %v927_v3 }
  0xdf   : > { %3886 = vst [vmem:[#allocation12_spill] sm:$0xff] %v2745_v5  ;;  %v1092_v30 = vadd.f32 %v1054_v28, %v954_v8  ;;  %v2750_v54 = vsel %vm1024_vm14, %v1322_v25, %v1324_v52  ;;  %v2753_v40 = vsel %vm1146_vm15, %v1443_v53, %v1445_v12  ;;  %v1592_v42 = vrot.slane %v1538_v46, 1 }
  0xe0   : > { %v2732_v41 = vpop.f32.mrf.mxu2  ;;  %3887 = vst [vmem:[#allocation13_spill] sm:$0xff] %v2750_v54  ;;  %v1659_v55 = vmul.f32 %v2575_v18, %v2668_v37  ;;  %v1660_v33 = vmul.f32 %v2575_v18, %v927_v3  ;;  %v720_v4 = vadd.f32 %v2489_v31, %v686_v22  ;;  %v1594_v44 = vrot.slane %v1539_v47, 1 }
  0xe1   : > { %v2735_v27 = vpop.f32.mrf.mxu0  ;;  %v616_v14 = vpop.f32.mrf.mxu1  ;;  %3888 = vst [vmem:[#allocation14_spill] sm:$0xff] %v2753_v40  ;;  %v2760_v39 = vadd.f32 %v1176_v16, %v1092_v30  ;;  %v763_v8 = vmax.f32 %v733_v23, 0.0  ;;  %v2764_v10 = vsel %vm1024_vm14, %v1591_v20, %v1592_v42  ;;  %v679_v16 = vmul.f32 %v2484_v29, %v2682_v36 }
  0xe2   : > { %3889 = vst [vmem:[#allocation15_spill] sm:$0xff] %v2764_v10  ;;  %v1713_v53 = vrot.slane %v1659_v55, 2  ;;  %v1715_v25 = vrot.slane %v1660_v33, 2  ;;  %v750_v11 = vmax.f32 %v720_v4, 0.0  ;;  %v2767_v14 = vsel %vm1024_vm14, %v1592_v42, %v1594_v44 }
  0xe3   : > { %3890 = vst [vmem:[#allocation16_spill] sm:$0xff] %v2767_v14  ;;  %v793_v52 = vmin.f32 %v763_v8, 6.0  ;;  %v3891_v22 = vrot.slane %v2657_v21, 2  ;;  %v3894_v12 = vmov 0  ;;  %v2789_v51 = vmul.f32 %v2575_v18, %v2677_v26 }
  0xe4   : > { %v2778_v20 = vsel %vm1146_vm15, %v1713_v53, %v1715_v25  ;;  %v780_v3 = vmin.f32 %v750_v11, 6.0  ;;  %v3895_v12 = vsel %vm2780_vm11, 4294967295, %v3894_v12  ;;  %v713_v36 = vadd.f32 %v2489_v31, %v679_v16 }
  0xe5   : > { %v2775_v23 = vsel %vm1146_vm15, %v3891_v22, %v1713_v53  ;;  %3893 = vst [vmem:[#allocation18_spill] sm:$0xff] %v2778_v20  ;;  %v687_v46 = vmul.f32 %v2484_v29, %v2684_v13  ;;  %v2808_v42 = vmul.f32 %v2547_v2, %v2597_v34  ;;  %v2812_v55 = vmul.f32 %v2556_v6, %v2597_v34 }
  0xe6   : > { %3892 = vst [vmem:[#allocation17_spill] sm:$0xff] %v2775_v23  ;;  %v949_v33 = vmul.f32 %v2534_v59, %v2677_v26  ;;  %v1040_v4 = vrot.slane %v2694_v24, 1  ;;  %v1162_v44 = vrot.slane %v2704_v50, 2  ;;  %v2820_v13 = vmul.f32 %v2547_v2, %v2677_v26 }
  0xe7   : > { %3896 = vst [vmem:[#allocation19_spill] sm:$0xff] %v3895_v12  ;;  %v2824_v8 = vmul.f32 %v2556_v6, %v2677_v26  ;;  %v1311_v53 = vrot.slane %v2708_v60, 1  ;;  %v1432_v24 = vrot.slane %v2712_v19, 2  ;;  %v920_v50 = vsel %vm2637_vm2, %v780_v3, 0.0 }
  0xe8   : > { %v2803_v30 = vpop.f32.mrf.mxu2  ;;  %3899 = vst [vmem:[#allocation20_spill] sm:$0xff] %v2808_v42  ;;  %v933_v25 = vsel %vm2795_vm13, %v793_v52, 0.0  ;;  %v743_v16 = vmax.f32 %v713_v36, 0.0  ;;  %v721_v0 = vadd.f32 %v2489_v31, %v687_v46  ;;  %v2842_v22 = vmul.f32 %v2547_v2, %v920_v50 }
  0xe9   : > { %v2785_v28 = vpop.f32.mrf.mxu0  ;;  %3900 = vst [vmem:[#allocation21_spill] sm:$0xff] %v2812_v55  ;;  %v694_v60 = vmul.f32 %v2484_v29, %v2732_v41  ;;  %v2851_v19 = vadd.s32 6, %v2492_v32  ;;  %v2855_v52 = vmul.f32 %v2484_v29, %v2735_v27  ;;  %v2858_v3 = vmul.f32 %v2530_v56, %v933_v25 }
  0xea   : > { %3901 = vst [vmem:[#allocation22_spill] sm:$0xff] %v2820_v13  ;;  %v773_v21 = vmin.f32 %v743_v16, 6.0  ;;  %v751_v36 = vmax.f32 %v721_v0, 0.0  ;;  %v986_v46 = vmul.f32 %v2530_v56, %v920_v50  ;;  %v2862_v47 = vmul.f32 %v2556_v6, %v920_v50 }
  0xeb   : > { %3902 = vst [vmem:[#allocation23_spill] sm:$0xff] %v2824_v8  ;;  %v2865_v26 = vmul.f32 %v2532_v57, %v933_v25  ;;  %v2868_v41 = vmul.f32 %v2536_v61, %v933_v25  ;;  %v2871_v11 = vmul.f32 %v2538_v62, %v933_v25  ;;  %v2878_v16 = vmul.f32 %v2540_v63, %v933_v25 }
  0xec   : > { %3905 = vst [vmem:[#allocation24_spill] sm:$0xff] %v2842_v22  ;;  %v2880_v0 = vsel %vm850_vm3, %v773_v21, 0.0  ;;  %v781_v35 = vmin.f32 %v751_v36, 6.0  ;;  %v2883_v8 = vmul.f32 %v2575_v18, %v933_v25  ;;  %v1108_v13 = vmul.f32 %v2532_v57, %v920_v50  ;;  %v654_v36 = vpop.f32.mrf.mxu3  ;;  %vm3045_vm3 = vmand %vm2828_vm1, %vm879_vm8 }
  0xed   : > { %3906 = vst [vmem:[#allocation25_spill] sm:$0xff] %v2858_v3  ;;  %v1220_v22 = vmul.f32 %v2547_v2, %v2880_v0  ;;  %v1260_v15 = vmul.f32 %v2536_v61, %v920_v50  ;;  %v1381_v21 = vmul.f32 %v2538_v62, %v920_v50  ;;  %vm820_vm2 = vcmp.ge.s32.totalorder %v2851_v19, 1 }
  0xee   : > { %3907 = vst [vmem:[#allocation26_spill] sm:$0xff] %v2862_v47  ;;  %v1041_v47 = vrot.slane %v986_v46, 1  ;;  %v950_v46 = vmul.f32 %v2534_v59, %v920_v50  ;;  %v1163_v3 = vrot.slane %v1108_v13, 2  ;;  %vm830_vm7 = vcmp.le.s32.totalorder %v2851_v19, 16 }
  0xef   : > { %3908 = vst [vmem:[#allocation27_spill] sm:$0xff] %v2865_v26  ;;  %v2896_v25 = vadd.f32 %v1220_v22, %v2675_v58  ;;  %v1312_v40 = vrot.slane %v1260_v15, 1  ;;  %v1433_v22 = vrot.slane %v1381_v21, 2  ;;  %vm2951_vm9 = vmand %vm820_vm2, %vm830_vm7  ;;  %v2959_v19 = vmul.f32 %v2536_v61, %v2880_v0 }
  0xf0   : > { %3909 = vst [vmem:[#allocation28_spill] sm:$0xff] %v2868_v41  ;;  %v1042_v9 = vsel %vm1024_vm14, %v1040_v4, %v1041_v47  ;;  %v2892_v12 = vpop.f32.mrf.mxu2  ;;  %v1653_v4 = vmul.f32 %v2575_v18, %v920_v50  ;;  %vm865_vm10 = vmand %vm2951_vm9, %vm844_vm5  ;;  %v804_v34 = vadd.s32 4, %v2492_v32 }
  0xf1   : > { %3910 = vst [vmem:[#allocation29_spill] sm:$0xff] %v2871_v11  ;;  %v598_v27 = vpop.f32.mrf.mxu0  ;;  %v1087_v23 = vadd.f32 %v1042_v9, %v949_v33  ;;  %v1164_v33 = vsel %vm1146_vm15, %v1162_v44, %v1163_v3  ;;  %v2909_v55 = vsel %vm1024_vm14, %v1311_v53, %v1312_v40  ;;  %v2915_v15 = vsel %vm1146_vm15, %v1432_v24, %v1433_v22 }
  0xf2   : > { %3911 = vst [vmem:[#allocation30_spill] sm:$0xff] %v2878_v16  ;;  %v921_v27 = vsel %vm891_vm4, %v781_v35, 0.0  ;;  %v1532_v35 = vmul.f32 %v2540_v63, %v920_v50  ;;  %v1703_v53 = vrot.slane %v1653_v4, 2  ;;  %v3917_v24 = vrot.slane %v2722_v49, 1 }
  0xf3   : > { %3912 = vst [vmem:[#allocation31_spill] sm:$0xff] %v2883_v8  ;;  %v987_v20 = vmul.f32 %v2530_v56, %v921_v27  ;;  %v1109_v14 = vmul.f32 %v2532_v57, %v921_v27  ;;  %v1261_v10 = vmul.f32 %v2536_v61, %v921_v27  ;;  %v1382_v58 = vmul.f32 %v2538_v62, %v921_v27 }
  0xf4   : > { %v1533_v5 = vmul.f32 %v2540_v63, %v921_v27  ;;  %3913 = vst [vmem:[#allocation32_spill] sm:$0xff] %v2909_v55  ;;  %v2912_v54 = vadd.f32 %v1164_v33, %v1087_v23  ;;  %v1582_v1 = vrot.slane %v1532_v35, 1  ;;  %v1654_v44 = vmul.f32 %v2575_v18, %v921_v27 }
  0xf5   : > { %v1043_v7 = vrot.slane %v987_v20, 1  ;;  %v1165_v26 = vrot.slane %v1109_v14, 2  ;;  %v1314_v50 = vrot.slane %v1261_v10, 1  ;;  %3914 = vst [vmem:[#allocation33_spill] sm:$0xff] %v2915_v15  ;;  %v1435_v21 = vrot.slane %v1382_v58, 2 }
  0xf6   : > { %v728_v10 = vadd.f32 %v2489_v31, %v694_v60  ;;  %v1705_v60 = vrot.slane %v1654_v44, 2  ;;  %v2945_v4 = vmul.f32 %v2530_v56, %v2880_v0  ;;  %v700_v33 = vmul.f32 %v2484_v29, %v654_v36 }
  0xf7   : > { %v1044_v9 = vsel %vm1024_vm14, %v1041_v47, %v1043_v7  ;;  %v1166_v13 = vsel %vm1146_vm15, %v1163_v3, %v1165_v26  ;;  %v2918_v14 = vsel %vm1024_vm14, %v1312_v40, %v1314_v50  ;;  %v1584_v47 = vrot.slane %v1533_v5, 1  ;;  %v618_v5 = vpop.f32.mrf.mxu1 }
  0xf8   : > { %v1088_v20 = vadd.f32 %v1044_v9, %v950_v46  ;;  %3915 = vst [vmem:[#allocation34_spill] sm:$0xff] %v2918_v14  ;;  %v643_v46 = vpop.f32.mrf.mxu2  ;;  %v2925_v23 = vsel %vm1146_vm15, %v1433_v22, %v1435_v21  ;;  %v2930_v26 = vsel %vm1024_vm14, %v3917_v24, %v1582_v1  ;;  %v3920_v3 = vrot.slane %v2789_v51, 2  ;;  %v656_v21 = vpop.f32.mrf.mxu3 }
  0xf9   : > { %3916 = vst [vmem:[#allocation35_spill] sm:$0xff] %v2925_v23  ;;  %v2933_v40 = vsel %vm1024_vm14, %v1582_v1, %v1584_v47  ;;  %v758_v35 = vmax.f32 %v728_v10, 0.0  ;;  %v2949_v1 = vmul.f32 %v2532_v57, %v2880_v0  ;;  %v714_v51 = vadd.f32 %v2489_v31, %v2855_v52 }
  0xfa   : > { %v2920_v7 = vadd.f32 %v1166_v13, %v1088_v20  ;;  %3918 = vst [vmem:[#allocation36_spill] sm:$0xff] %v2930_v26  ;;  %v2939_v27 = vsel %vm1146_vm15, %v3920_v3, %v1703_v53  ;;  %v2962_v22 = vsel %vm1146_vm15, %v1703_v53, %v1705_v60  ;;  %v1374_v52 = vmul.f32 %v2538_v62, %v2880_v0 }
  0xfb   : > { %3919 = vst [vmem:[#allocation37_spill] sm:$0xff] %v2933_v40  ;;  %v788_v9 = vmin.f32 %v758_v35, 6.0  ;;  %v808_v20 = vadd.s32 8, %v2492_v32  ;;  %v681_v13 = vmul.f32 %v2484_v29, %v2785_v28  ;;  %v744_v44 = vmax.f32 %v714_v51, 0.0 }
  0xfc   : > { %3921 = vst [vmem:[#allocation38_spill] sm:$0xff] %v2939_v27  ;;  %v695_v53 = vmul.f32 %v2484_v29, %v2803_v30  ;;  %v688_v10 = vmul.f32 %v2484_v29, %v618_v5  ;;  %v945_v24 = vmul.f32 %v2534_v59, %v2880_v0  ;;  %v1030_v60 = vrot.slane %v2945_v4, 1 }
  0xfd   : > { %3924 = vst [vmem:[#allocation39_spill] sm:$0xff] %v2962_v22  ;;  %v928_v47 = vsel %vm865_vm10, %v788_v9, 0.0  ;;  %v1152_v28 = vrot.slane %v2949_v1, 2  ;;  %v1301_v35 = vrot.slane %v2959_v19, 1  ;;  %v734_v51 = vadd.f32 %v2489_v31, %v700_v33 }
  0xfe   : > { %v1230_v3 = vmul.f32 %v2547_v2, %v928_v47  ;;  %v1422_v30 = vrot.slane %v1374_v52, 2  ;;  %vm822_vm12 = vcmp.ge.s32.totalorder %v808_v20, 1  ;;  %v715_v9 = vadd.f32 %v2489_v31, %v681_v13 }
  0xff   : > { %v774_v46 = vmin.f32 %v744_v44, 6.0  ;;  %vm832_vm13 = vcmp.le.s32.totalorder %v808_v20, 16  ;;  %v729_v0 = vadd.f32 %v2489_v31, %v695_v53  ;;  %v2993_v36 = vadd.f32 %v2489_v31, %v688_v10  ;;  %v3007_v33 = vpop.f32.mrf.mxu1 }
 0x100   : > { %v2988_v5 = vadd.f32 %v1230_v3, %v2737_v17  ;;  %v2996_v4 = vmul.f32 %v2534_v59, %v928_v47  ;;  %v2999_v1 = vmul.f32 %v2530_v56, %v928_v47  ;;  %v3002_v19 = vmul.f32 %v2532_v57, %v928_v47  ;;  %vm3029_vm0 = vmand %vm822_vm12, %vm832_vm13 }
 0x101   : > { %v3005_v17 = vmul.f32 %v2536_v61, %v928_v47  ;;  %v3010_v52 = vmul.f32 %v2538_v62, %v928_v47  ;;  %v3013_v13 = vmul.f32 %v2556_v6, %v928_v47  ;;  %v914_v44 = vsel %vm2828_vm1, %v774_v46, 0.0  ;;  %vm871_vm4 = vmand %vm3029_vm0, %vm844_vm5 }
 0x102   : > { %v764_v53 = vmax.f32 %v734_v51, 0.0  ;;  %v980_v10 = vmul.f32 %v2530_v56, %v914_v44  ;;  %v1102_v3 = vmul.f32 %v2532_v57, %v914_v44  ;;  %v1221_v50 = vmul.f32 %v2547_v2, %v914_v44  ;;  %vm900_vm12 = vmand %vm2951_vm9, %vm879_vm8 }
 0x103   : > { %3925 = vst [vmem:[#allocation40_spill] sm:$0xff] %v3013_v13  ;;  %v745_v49 = vmax.f32 %v715_v9, 0.0  ;;  %v3021_v8 = vmul.f32 %v2540_v63, %v928_v47  ;;  %v1254_v16 = vmul.f32 %v2536_v61, %v914_v44  ;;  %v1375_v11 = vmul.f32 %v2538_v62, %v914_v44  ;;  %v3033_v9 = vpop.f32.mrf.mxu3  ;;  %vm853_vm13 = vmand %vm2511_vm6, %vm844_vm5 }
 0x104   : > { %v759_v41 = vmax.f32 %v729_v0, 0.0  ;;  %v1031_v27 = vrot.slane %v980_v10, 1  ;;  %v1153_v46 = vrot.slane %v1102_v3, 2  ;;  %v1237_v51 = vadd.f32 %v1221_v50, %v2718_v48 }
 0x105   : > { %v3037_v40 = vmul.f32 %v2575_v18, %v928_v47  ;;  %v1302_v0 = vrot.slane %v1254_v16, 1  ;;  %v1423_v26 = vrot.slane %v1375_v11, 2  ;;  %v794_v48 = vmin.f32 %v764_v53, 6.0 }
 0x106   : > { %v1032_v10 = vsel %vm1024_vm14, %v1030_v60, %v1031_v27  ;;  %v1154_v3 = vsel %vm1146_vm15, %v1152_v28, %v1153_v46  ;;  %v775_v50 = vmin.f32 %v745_v49, 6.0  ;;  %v789_v11 = vmin.f32 %v759_v41, 6.0 }
 0x107   : > { %v1083_v15 = vadd.f32 %v1032_v10, %v945_v24  ;;  %v1303_v47 = vsel %vm1024_vm14, %v1301_v35, %v1302_v0  ;;  %v1424_v16 = vsel %vm1146_vm15, %v1422_v30, %v1423_v26  ;;  %v701_v28 = vmul.f32 %v2484_v29, %v656_v21 }
 0x108   : > { %v1357_v60 = vadd.f32 %v1303_v47, %v2896_v25  ;;  %v752_v30 = vmax.f32 %v2993_v36, 0.0  ;;  %v946_v10 = vmul.f32 %v2534_v59, %v914_v44  ;;  %v934_v41 = vsel %vm871_vm4, %v794_v48, 0.0  ;;  %v3069_v47 = vpop.f32.mrf.mxu1 }
 0x109   : > { %v3061_v53 = vadd.f32 %v1154_v3, %v1083_v15  ;;  %v915_v25 = vsel %vm3045_vm3, %v775_v50, 0.0  ;;  %v3073_v21 = vsel %vm2951_vm9, %v789_v11, 0.0  ;;  %vm818_vm1 = vcmp.ge.s32.totalorder %v804_v34, 1  ;;  %vm3280_vm9 = vmand %vm3029_vm0, %vm879_vm8 }
 0x10a   : > { %v3065_v22 = vadd.f32 %v1424_v16, %v1357_v60  ;;  %v981_v35 = vmul.f32 %v2530_v56, %v915_v25  ;;  %v1103_v15 = vmul.f32 %v2532_v57, %v915_v25  ;;  %v1255_v36 = vmul.f32 %v2536_v61, %v915_v25  ;;  %vm868_vm3 = vmand %vm2780_vm11, %vm844_vm5 }
 0x10b   : > { %v1376_v44 = vmul.f32 %v2538_v62, %v915_v25  ;;  %vm828_vm2 = vcmp.le.s32.totalorder %v804_v34, 16  ;;  %v735_v3 = vadd.f32 %v2489_v31, %v701_v28  ;;  %v661_v48 = vpop.f32.mrf.mxu3  ;;  %v1274_v50 = vmul.f32 %v2536_v61, %v934_v41 }
 0x10c   : > { %3930 = vst [vmem:[#allocation41_spill] sm:$0xff] %v3065_v22  ;;  %v1033_v20 = vrot.slane %v981_v35, 1  ;;  %v1155_v16 = vrot.slane %v1103_v15, 2  ;;  %v1304_v60 = vrot.slane %v1255_v36, 1  ;;  %vm3081_vm7 = vmand %vm818_vm1, %vm828_vm2  ;;  %v3086_v24 = vmul.f32 %v2538_v62, %v934_v41 }
 0x10d   : > { %v1546_v49 = vmul.f32 %v2540_v63, %v934_v41  ;;  %v1667_v25 = vmul.f32 %v2575_v18, %v934_v41  ;;  %v1425_v34 = vrot.slane %v1376_v44, 2  ;;  %v782_v15 = vmin.f32 %v752_v30, 6.0  ;;  %vm859_vm10 = vmand %vm3081_vm7, %vm844_vm5 }
 0x10e   : > { %3933 = vst [vmem:[#allocation42_spill] sm:$0xff] %v3086_v24  ;;  %v1034_v28 = vsel %vm1024_vm14, %v1031_v27, %v1033_v20  ;;  %v1156_v48 = vsel %vm1146_vm15, %v1153_v46, %v1155_v16  ;;  %v1305_v35 = vsel %vm1024_vm14, %v1302_v0, %v1304_v60  ;;  %v765_v32 = vmax.f32 %v735_v3, 0.0 }
 0x10f   : > { %v1084_v36 = vadd.f32 %v1034_v28, %v946_v10  ;;  %v1358_v14 = vadd.f32 %v1305_v35, %v1237_v51  ;;  %v1426_v55 = vsel %vm1146_vm15, %v1423_v26, %v1425_v34  ;;  %v3100_v44 = vmul.f32 %v2547_v2, %v934_v41 }
 0x110   : > { %v696_v27 = vmul.f32 %v2484_v29, %v2892_v12  ;;  %v3106_v46 = vmul.f32 %v2530_v56, %v3073_v21  ;;  %v1336_v51 = vrot.slane %v1274_v50, 1  ;;  %v3109_v26 = vmul.f32 %v2556_v6, %v934_v41  ;;  %v625_v10 = vpop.f32.mrf.mxu1 }
 0x111   : > { %3934 = vst [vmem:[#allocation43_spill] sm:$0xff] %v3100_v44  ;;  %v3111_v0 = vadd.f32 %v1156_v48, %v1084_v36  ;;  %v3113_v30 = vadd.f32 %v1426_v55, %v1358_v14  ;;  %v1606_v20 = vrot.slane %v1546_v49, 1  ;;  %v3118_v16 = vmul.f32 %v2556_v6, %v3073_v21 }
 0x112   : > { %3935 = vst [vmem:[#allocation44_spill] sm:$0xff] %v3109_v26  ;;  %v3120_v12 = vsel %vm859_vm10, %v782_v15, 0.0  ;;  %v1727_v60 = vrot.slane %v1667_v25, 2  ;;  %v795_v41 = vmin.f32 %v765_v32, 6.0  ;;  %v956_v55 = vmul.f32 %v2534_v59, %v3073_v21 }
 0x113   : > { %3936 = vst [vmem:[#allocation45_spill] sm:$0xff] %v3111_v0  ;;  %v3124_v50 = vmul.f32 %v2534_v59, %v3120_v12  ;;  %v3130_v14 = vmul.f32 %v2530_v56, %v3120_v12  ;;  %v730_v49 = vadd.f32 %v2489_v31, %v696_v27  ;;  %v1056_v34 = vrot.slane %v3106_v46, 1 }
 0x114   : > { %3937 = vst [vmem:[#allocation46_spill] sm:$0xff] %v3113_v30  ;;  %v1117_v28 = vmul.f32 %v2532_v57, %v3073_v21  ;;  %v3138_v25 = vmul.f32 %v2532_v57, %v3120_v12  ;;  %v3142_v32 = vmul.f32 %v2547_v2, %v3120_v12  ;;  %v3146_v48 = vsel %vm3029_vm0, %v795_v41, 0.0  ;;  %vm894_vm0 = vmand %vm3081_vm7, %vm879_vm8 }
 0x115   : > { %3938 = vst [vmem:[#allocation47_spill] sm:$0xff] %v3118_v16  ;;  %v1231_v35 = vmul.f32 %v2547_v2, %v3073_v21  ;;  %v3152_v15 = vmul.f32 %v2536_v61, %v3120_v12  ;;  %v3156_v36 = vmul.f32 %v2538_v62, %v3120_v12  ;;  %v3160_v27 = vmul.f32 %v2536_v61, %v3146_v48 }
 0x116   : > { %v1269_v46 = vmul.f32 %v2536_v61, %v3073_v21  ;;  %v3166_v10 = vmul.f32 %v2540_v63, %v3146_v48  ;;  %v3170_v41 = vmul.f32 %v2575_v18, %v3146_v48  ;;  %v760_v3 = vmax.f32 %v730_v49, 0.0 }
 0x117   : > { %v3939_v13 = vrot.slane %v2999_v1, 1  ;;  %v3177_v26 = vmul.f32 %v2556_v6, %v3120_v12  ;;  %v3857_v30 = vrot.slane %v3160_v27, 1  ;;  %v1178_v24 = vrot.slane %v1117_v28, 2 }
 0x118   : > { %v3856_v49 = vrot.slane %v3166_v10, 1  ;;  %v3858_v1 = vrot.slane %v3170_v41, 2  ;;  %v790_v16 = vmin.f32 %v760_v3, 6.0  ;;  %v3942_v22 = vrot.slane %v3002_v19, 2 }
 0x119   : > { %v1057_v44 = vsel %vm1024_vm14, %v3939_v13, %v1056_v34  ;;  %3940 = vst [vmem:[#allocation48_spill] sm:$0xff] %v3177_v26  ;;  %v1247_v13 = vadd.f32 %v1231_v35, %v2760_v39  ;;  %v3191_v26 = vsel %vm1024_vm14, %v1336_v51, %v3857_v30  ;;  %v1327_v42 = vrot.slane %v1269_v46, 1 }
 0x11a   : > { %v1093_v0 = vadd.f32 %v1057_v44, %v2996_v4  ;;  %3941 = vst [vmem:[#allocation49_spill] sm:$0xff] %v3191_v26  ;;  %v1179_v58 = vsel %vm1146_vm15, %v3942_v22, %v1178_v24  ;;  %v1390_v4 = vmul.f32 %v2538_v62, %v3073_v21  ;;  %v3201_v44 = vsel %vm1024_vm14, %v1606_v20, %v3856_v49 }
 0x11b   : > { %3943 = vst [vmem:[#allocation50_spill] sm:$0xff] %v3201_v44  ;;  %v3206_v39 = vsel %vm1146_vm15, %v1727_v60, %v3858_v1  ;;  %v930_v51 = vsel %vm900_vm12, %v790_v16, 0.0  ;;  %v3946_v35 = vrot.slane %v3005_v17, 1  ;;  %v1541_v16 = vmul.f32 %v2540_v63, %v3073_v21 }
 0x11c   : > { %3944 = vst [vmem:[#allocation51_spill] sm:$0xff] %v3206_v39  ;;  %v3208_v3 = vadd.f32 %v1179_v58, %v1093_v0  ;;  %v996_v19 = vmul.f32 %v2530_v56, %v930_v51  ;;  %v1118_v22 = vmul.f32 %v2532_v57, %v930_v51  ;;  %v1270_v28 = vmul.f32 %v2536_v61, %v930_v51 }
 0x11d   : > { %v1328_v46 = vsel %vm1024_vm14, %v3946_v35, %v1327_v42  ;;  %v1391_v49 = vmul.f32 %v2538_v62, %v930_v51  ;;  %v1448_v30 = vrot.slane %v1390_v4, 2  ;;  %v1542_v1 = vmul.f32 %v2540_v63, %v930_v51 }
 0x11e   : > { %3945 = vst [vmem:[#allocation52_spill] sm:$0xff] %v3208_v3  ;;  %v1367_v20 = vadd.f32 %v1328_v46, %v2988_v5  ;;  %v1058_v0 = vrot.slane %v996_v19, 1  ;;  %v1180_v60 = vrot.slane %v1118_v22, 2  ;;  %v1329_v58 = vrot.slane %v1270_v28, 1  ;;  %v600_v22 = vpop.f32.mrf.mxu0 }
 0x11f   : > { %v3947_v26 = vrot.slane %v3010_v52, 2  ;;  %v1450_v17 = vrot.slane %v1391_v49, 2  ;;  %v1597_v44 = vrot.slane %v1541_v16, 1  ;;  %v1662_v5 = vmul.f32 %v2575_v18, %v3073_v21 }
 0x120   : > { %v1059_v35 = vsel %vm1024_vm14, %v1056_v34, %v1058_v0  ;;  %v1181_v4 = vsel %vm1146_vm15, %v1178_v24, %v1180_v60  ;;  %v1330_v46 = vsel %vm1024_vm14, %v1327_v42, %v1329_v58  ;;  %v1599_v16 = vrot.slane %v1542_v1, 1 }
 0x121   : > { %v1449_v39 = vsel %vm1146_vm15, %v3947_v26, %v1448_v30  ;;  %v1094_v28 = vadd.f32 %v1059_v35, %v956_v55  ;;  %v1368_v3 = vadd.f32 %v1330_v46, %v1247_v13  ;;  %v1451_v52 = vsel %vm1146_vm15, %v1448_v30, %v1450_v17 }
 0x122   : > { %v3229_v19 = vadd.f32 %v1449_v39, %v1367_v20  ;;  %v3948_v26 = vrot.slane %v3021_v8, 1  ;;  %v1663_v21 = vmul.f32 %v2575_v18, %v930_v51  ;;  %v1718_v34 = vrot.slane %v1662_v5, 2 }
 0x123   : > { %v689_v24 = vmul.f32 %v2484_v29, %v3007_v33  ;;  %v3240_v42 = vadd.f32 %v1181_v4, %v1094_v28  ;;  %v3242_v39 = vadd.f32 %v1451_v52, %v1368_v3  ;;  %v702_v55 = vmul.f32 %v2484_v29, %v3033_v9 }
 0x124   : > { %v3235_v49 = vsel %vm1024_vm14, %v3948_v26, %v1597_v44  ;;  %v682_v30 = vmul.f32 %v2484_v29, %v600_v22  ;;  %v3248_v8 = vsel %vm1024_vm14, %v1597_v44, %v1599_v16  ;;  %v3949_v1 = vrot.slane %v3037_v40, 2 }
 0x125   : > { %v1720_v51 = vrot.slane %v1663_v21, 2  ;;  %v723_v33 = vadd.f32 %v2489_v31, %v689_v24  ;;  %v3258_v3 = vmul.f32 %v2540_v63, %v3120_v12  ;;  %v736_v20 = vadd.f32 %v2489_v31, %v702_v55  ;;  %v645_v21 = vpop.f32.mrf.mxu2 }
 0x126   : > { %v3253_v13 = vsel %vm1146_vm15, %v3949_v1, %v1718_v34  ;;  %v716_v9 = vadd.f32 %v2489_v31, %v682_v30  ;;  %v690_v44 = vmul.f32 %v2484_v29, %v3069_v47  ;;  %v1045_v0 = vrot.slane %v3130_v14, 1 }
 0x127   : > { %3950 = vst [vmem:[#allocation53_spill] sm:$0xff] %v3253_v13  ;;  %v3267_v40 = vmul.f32 %v2575_v18, %v3120_v12  ;;  %v3270_v60 = vsel %vm1146_vm15, %v1718_v34, %v1720_v51  ;;  %v753_v58 = vmax.f32 %v723_v33, 0.0  ;;  %v3274_v17 = vmul.f32 %v2538_v62, %v3146_v48 }
 0x128   : > { %v766_v5 = vmax.f32 %v736_v20, 0.0  ;;  %v746_v47 = vmax.f32 %v716_v9, 0.0  ;;  %v724_v12 = vadd.f32 %v2489_v31, %v690_v44  ;;  %v3288_v4 = vadd.f32 %v3142_v32, %v2912_v54 }
 0x129   : > { %3951 = vst [vmem:[#allocation54_spill] sm:$0xff] %v3274_v17  ;;  %v783_v28 = vmin.f32 %v753_v58, 6.0  ;;  %v3300_v54 = vmul.f32 %v2547_v2, %v3146_v48  ;;  %v3304_v32 = vmul.f32 %v2556_v6, %v3146_v48  ;;  %v3311_v55 = vmul.f32 %v2547_v2, %v2668_v37 }
 0x12a   : > { %v796_v52 = vmin.f32 %v766_v5, 6.0  ;;  %v776_v31 = vmin.f32 %v746_v47, 6.0  ;;  %v754_v16 = vmax.f32 %v724_v12, 0.0  ;;  %v3961_v26 = vrot.slane %v3170_v41, 2 }
 0x12b   : > { %3954 = vst [vmem:[#allocation55_spill] sm:$0xff] %v3300_v54  ;;  %v3321_v33 = vsel %vm3081_vm7, %v783_v28, 0.0  ;;  %v3963_v13 = vrot.slane %v3138_v25, 2  ;;  %v3965_v25 = vld [vmem:[#allocation20_spill] sm:$0xff] }
 0x12c   : > { %3955 = vst [vmem:[#allocation56_spill] sm:$0xff] %v3304_v32  ;;  %v936_v34 = vsel %vm3280_vm9, %v796_v52, 0.0  ;;  %v916_v24 = vsel %vm853_vm13, %v776_v31, 0.0  ;;  %v784_v47 = vmin.f32 %v754_v16, 6.0  ;;  %v3332_v12 = vmul.f32 %v2556_v6, %v3321_v33 }
 0x12d   : > { %v1276_v30 = vmul.f32 %v2536_v61, %v936_v34  ;;  %v3315_v1 = vmul.f32 %v2538_v62, %v936_v34  ;;  %v1548_v51 = vmul.f32 %v2540_v63, %v936_v34  ;;  %v1669_v48 = vmul.f32 %v2575_v18, %v936_v34 }
 0x12e   : > { %v3324_v20 = vmul.f32 %v2530_v56, %v916_v24  ;;  %v3327_v9 = vmul.f32 %v2532_v57, %v916_v24  ;;  %v1222_v44 = vmul.f32 %v2547_v2, %v916_v24  ;;  %v3335_v52 = vmul.f32 %v2534_v59, %v916_v24 }
 0x12f   : > { %3956 = vst [vmem:[#allocation57_spill] sm:$0xff] %v3315_v1  ;;  %v1339_v58 = vrot.slane %v1276_v30, 1  ;;  %v1609_v5 = vrot.slane %v1548_v51, 1  ;;  %v1730_v29 = vrot.slane %v1669_v48, 2  ;;  %v3338_v28 = vmul.f32 %v2536_v61, %v916_v24 }
 0x130   : > { %v3346_v31 = vmul.f32 %v2556_v6, %v2668_v37  ;;  %v3957_v16 = vrot.slane %v3160_v27, 1  ;;  %v3959_v51 = vrot.slane %v3166_v10, 1  ;;  %v3367_v27 = vadd.f32 %v1222_v44, %v3061_v53 }
 0x131   : > { %v3362_v11 = vsel %vm1146_vm15, %v3961_v26, %v1730_v29  ;;  %v989_v41 = vmul.f32 %v2530_v56, %v3321_v33  ;;  %v3377_v26 = vmul.f32 %v2540_v63, %v916_v24  ;;  %v3380_v29 = vmul.f32 %v2575_v18, %v916_v24 }
 0x132   : > { %v3351_v34 = vsel %vm1024_vm14, %v3957_v16, %v1339_v58  ;;  %v3357_v48 = vsel %vm1024_vm14, %v3959_v51, %v1609_v5  ;;  %3962 = vst [vmem:[#allocation60_spill] sm:$0xff] %v3362_v11  ;;  %v3370_v58 = vmul.f32 %v2538_v62, %v916_v24  ;;  %v1495_v5 = vmul.f32 %v2556_v6, %v916_v24 }
 0x133   : > { %3958 = vst [vmem:[#allocation58_spill] sm:$0xff] %v3351_v34  ;;  %v924_v16 = vsel %vm894_vm0, %v784_v47, 0.0  ;;  %v952_v53 = vmul.f32 %v2534_v59, %v3321_v33  ;;  %v1046_v51 = vrot.slane %v989_v41, 1  ;;  %v1111_v30 = vmul.f32 %v2532_v57, %v3321_v33 }
 0x134   : > { %3960 = vst [vmem:[#allocation59_spill] sm:$0xff] %v3357_v48  ;;  %v990_v44 = vmul.f32 %v2530_v56, %v924_v16  ;;  %v1112_v47 = vmul.f32 %v2532_v57, %v924_v16  ;;  %v1227_v10 = vmul.f32 %v2547_v2, %v3321_v33  ;;  %v1263_v37 = vmul.f32 %v2536_v61, %v3321_v33 }
 0x135   : > { %v1264_v18 = vmul.f32 %v2536_v61, %v924_v16  ;;  %v1384_v24 = vmul.f32 %v2538_v62, %v3321_v33  ;;  %v1047_v41 = vsel %vm1024_vm14, %v1045_v0, %v1046_v51  ;;  %v1168_v22 = vrot.slane %v1111_v30, 2 }
 0x136   : > { %v1048_v23 = vrot.slane %v990_v44, 1  ;;  %v1170_v46 = vrot.slane %v1112_v47, 2  ;;  %v1243_v35 = vadd.f32 %v1227_v10, %v2920_v7  ;;  %v1089_v44 = vadd.f32 %v1047_v41, %v3124_v50  ;;  %v3968_v47 = vld [vmem:[#allocation11_spill] sm:$0xff]  ;;  %v3969_v41 = vld [vmem:[#allocation13_spill] sm:$0xff] }
 0x137   : > { %v1317_v34 = vrot.slane %v1263_v37, 1  ;;  %v1319_v54 = vrot.slane %v1264_v18, 1  ;;  %v1169_v48 = vsel %vm1146_vm15, %v3963_v13, %v1168_v22  ;;  %v1385_v14 = vmul.f32 %v2538_v62, %v924_v16 }
 0x138   : > { %v1049_v43 = vsel %vm1024_vm14, %v1046_v51, %v1048_v23  ;;  %v1171_v32 = vsel %vm1146_vm15, %v1168_v22, %v1170_v46  ;;  %v1211_v0 = vadd.f32 %v1169_v48, %v1089_v44  ;;  %v3964_v30 = vrot.slane %v3152_v15, 1 }
 0x139   : > { %v1090_v11 = vadd.f32 %v1049_v43, %v952_v53  ;;  %v1320_v23 = vsel %vm1024_vm14, %v1317_v34, %v1319_v54  ;;  %v1438_v10 = vrot.slane %v1384_v24, 2  ;;  %v1440_v53 = vrot.slane %v1385_v14, 2  ;;  %v3970_v14 = vld [vmem:[#allocation21_spill] sm:$0xff] }
 0x13a   : > { %v1318_v7 = vsel %vm1024_vm14, %v3964_v30, %v1317_v34  ;;  %v1364_v43 = vadd.f32 %v1320_v23, %v1243_v35  ;;  %v1244_v51 = vadd.f32 %v3965_v25, %v1211_v0  ;;  %v3966_v13 = vrot.slane %v3156_v36, 2  ;;  %v3423_v35 = vld [vmem:[%s3835_s4 + $0x8] ss:$0 sm:$0xff]  ;;  %v3967_v34 = vld [vmem:[#allocation41_spill] sm:$0xff] }
 0x13b   : > { %v1212_v50 = vadd.f32 %v1171_v32, %v1090_v11  ;;  %v1363_v37 = vadd.f32 %v1318_v7, %v3288_v4  ;;  %v1535_v22 = vmul.f32 %v2540_v63, %v3321_v33  ;;  %v1536_v15 = vmul.f32 %v2540_v63, %v924_v16  ;;  %v602_v7 = vpop.f32.mrf.mxu0  ;;  %v3996_v4 = vld [vmem:[#allocation45_spill] sm:$0xff] }
 0x13c   : > { %v1439_v46 = vsel %vm1146_vm15, %v3966_v13, %v1438_v10  ;;  %v1441_v54 = vsel %vm1146_vm15, %v1438_v10, %v1440_v53  ;;  %v1656_v36 = vmul.f32 %v3423_v35, %v3321_v33  ;;  %v3429_v11 = vadd.f32 %v1495_v5, %v3967_v34  ;;  %v3971_v33 = vld [vmem:[#allocation12_spill] sm:$0xff]  ;;  %v3972_v53 = vld [vmem:[#allocation14_spill] sm:$0xff] }
 0x13d   : > { %v1245_v48 = vadd.f32 %v3311_v55, %v1212_v50  ;;  %v1484_v32 = vadd.f32 %v1439_v46, %v1363_v37  ;;  %v1365_v18 = vadd.f32 %v3968_v47, %v1244_v51  ;;  %v1485_v24 = vadd.f32 %v1441_v54, %v1364_v43  ;;  %v647_v37 = vpop.f32.mrf.mxu2  ;;  %v3973_v51 = vld [vmem:[#allocation15_spill] sm:$0xff] }
 0x13e   : > { %v1657_v30 = vmul.f32 %v3423_v35, %v924_v16  ;;  %v1587_v5 = vrot.slane %v1535_v22, 1  ;;  %v1589_v43 = vrot.slane %v1536_v15, 1  ;;  %v1708_v46 = vrot.slane %v1656_v36, 2  ;;  %v3974_v16 = vld [vmem:[#allocation40_spill] sm:$0xff]  ;;  %v3976_v47 = vld [vmem:[#allocation47_spill] sm:$0xff] }
 0x13f   : > { %v1366_v44 = vadd.f32 %v3969_v41, %v1245_v48  ;;  %v1517_v0 = vadd.f32 %v3970_v14, %v1484_v32  ;;  %v1486_v10 = vadd.f32 %v3971_v33, %v1365_v18  ;;  %v1518_v50 = vadd.f32 %v3346_v31, %v1485_v24  ;;  %v3444_v48 = vld [vmem:[%s3836_s5] ss:$0 sm:$0xff]  ;;  %v3975_v32 = vld [vmem:[#allocation16_spill] sm:$0xff]  ;;  %v3977_v24 = vld [vmem:[#allocation17_spill] sm:$0xff] }
 0x140   : > { %v3451_v31 = vld [vmem:[%s3833_s2] ss:$0 sm:$0xff]  ;;  %v1710_v18 = vrot.slane %v1657_v30, 2  ;;  %v3979_v33 = vld [vmem:[#allocation18_spill] sm:$0xff] }
 0x141   : > { %v1487_v25 = vadd.f32 %v3972_v53, %v1366_v44  ;;  %v1638_v13 = vadd.f32 %v3973_v51, %v1517_v0  ;;  %v1519_v54 = vadd.f32 %v3974_v16, %v1486_v10  ;;  %v1639_v34 = vadd.f32 %v3975_v32, %v1518_v50  ;;  %v3460_v44 = vld [vmem:[%s3837_s6] ss:$0 sm:$0xff]  ;;  %v663_v50 = vpop.f32.mrf.mxu3  ;;  %v3981_v32 = vld [vmem:[#allocation42_spill] sm:$0xff] }
 0x142   : > { %v697_v22 = vmul.f32 %v3451_v31, %v645_v21  ;;  %v683_v15 = vmul.f32 %v3451_v31, %v602_v7  ;;  %v698_v14 = vmul.f32 %v3451_v31, %v647_v37  ;;  %v3470_v21 = vld [vmem:[%s3834_s3] ss:$0 sm:$0xff]  ;;  %v703_v37 = vmul.f32 %v3451_v31, %v663_v50 }
 0x143   : > { %v1520_v36 = vadd.f32 %v3976_v47, %v1487_v25  ;;  %v1759_v41 = vadd.f32 %v3977_v24, %v1638_v13  ;;  %v3464_v0 = vadd.f32 %v3235_v49, %v1519_v54  ;;  %v1760_v10 = vadd.f32 %v3979_v33, %v1639_v34 }
 0x144   : > { %v731_v30 = vadd.f32 %v3470_v21, %v697_v22  ;;  %v717_v7 = vadd.f32 %v3470_v21, %v683_v15  ;;  %v3478_v49 = vadd.f32 %v3470_v21, %v698_v14  ;;  %v3980_v54 = vrot.slane %v3274_v17, 2 }
 0x145   : > { %3978 = vst [vmem:[#allocation20_spill] sm:$0xff] %v3464_v0  ;;  %v1641_v53 = vadd.f32 %v3248_v8, %v1520_v36  ;;  %v1779_v25 = vmul.f32 %v3444_v48, %v1759_v41  ;;  %v1780_v51 = vmul.f32 %v3444_v48, %v1760_v10  ;;  %v3982_v34 = vrot.slane %v3981_v32, 2 }
 0x146   : > { %v761_v13 = vmax.f32 %v731_v30, 0.0  ;;  %v747_v16 = vmax.f32 %v717_v7, 0.0  ;;  %v3984_v8 = vrot.slane %v3258_v3, 1  ;;  %v3500_v41 = vadd.f32 %v3470_v21, %v703_v37 }
 0x147   : > { %v3486_v22 = vsel %vm1146_vm15, %v3982_v34, %v3980_v54  ;;  %v1762_v47 = vadd.f32 %v3270_v60, %v1641_v53  ;;  %v1799_v36 = vadd.f32 %v3460_v44, %v1779_v25  ;;  %v3503_v14 = vsel %vm1024_vm14, %v1587_v5, %v1589_v43  ;;  %v3988_v53 = vld [vmem:[#allocation3_spill] sm:$0xff] }
 0x148   : > { %3983 = vst [vmem:[#allocation41_spill] sm:$0xff] %v3486_v22  ;;  %v3491_v15 = vsel %vm1024_vm14, %v3984_v8, %v1587_v5  ;;  %v3986_v3 = vrot.slane %v3267_v40, 2  ;;  %v1800_v60 = vadd.f32 %v3460_v44, %v1780_v51  ;;  %v791_v10 = vmin.f32 %v761_v13, 6.0  ;;  %v3997_v22 = vld [vmem:[#allocation46_spill] sm:$0xff] }
 0x149   : > { %v3512_v30 = vsel %vm1146_vm15, %v1708_v46, %v1710_v18  ;;  %v1815_v7 = vmax.f32 %v1799_v36, 0.0  ;;  %v777_v50 = vmin.f32 %v747_v16, 6.0  ;;  %v809_v25 = vadd.s32 9, %v3988_v53 }
 0x14a   : > { %v3508_v33 = vsel %vm1146_vm15, %v3986_v3, %v1708_v46  ;;  %3987 = vst [vmem:[#allocation11_spill] sm:$0xff] %v3512_v30  ;;  %v3516_v37 = vmul.f32 %v3444_v48, %v1762_v47  ;;  %v1816_v5 = vmax.f32 %v1800_v60, 0.0  ;;  %v3518_v43 = vsel %vm868_vm3, %v791_v10, 0.0  ;;  %v3995_v10 = vld [vmem:[#allocation52_spill] sm:$0xff] }
 0x14b   : > { %v3521_v54 = vmin.f32 %v1815_v7, 6.0  ;;  %v3525_v51 = vmul.f32 %v2530_v56, %v3518_v43  ;;  %v3529_v46 = vmul.f32 %v2532_v57, %v3518_v43  ;;  %v767_v18 = vmax.f32 %v3500_v41, 0.0 }
 0x14c   : > { %3989 = vst [vmem:[#allocation13_spill] sm:$0xff] %v3516_v37  ;;  %v3532_v13 = vmin.f32 %v1816_v5, 6.0  ;;  %v1232_v16 = vmul.f32 %v2547_v2, %v3518_v43  ;;  %v3538_v32 = vmul.f32 %v2536_v61, %v3518_v43  ;;  %v3542_v34 = vmul.f32 %v2538_v62, %v3518_v43 }
 0x14d   : > { %3990 = vst [vmem:[#allocation21_spill] sm:$0xff] %v3521_v54  ;;  %v3546_v8 = vmul.f32 %v2534_v59, %v3518_v43  ;;  %v917_v47 = vsel %vm2511_vm6, %v777_v50, 0.0  ;;  %vm823_vm4 = vcmp.ge.s32.totalorder %v809_v25, 1  ;;  %vm833_vm1 = vcmp.le.s32.totalorder %v809_v25, 16  ;;  %v4017_v25 = vld [vmem:[#allocation23_spill] sm:$0xff] }
 0x14e   : > { %3991 = vst [vmem:[#allocation12_spill] sm:$0xff] %v3525_v51  ;;  %v2190_v36 = vpack.c.bf16 %v3532_v13, %v3521_v54  ;;  %v1505_v60 = vmul.f32 %v2556_v6, %v3518_v43  ;;  %v3557_v7 = vadd.f32 %v1232_v16, %v3995_v10  ;;  %v3563_v50 = vmul.f32 %v2540_v63, %v3518_v43  ;;  %v3999_v51 = vld [vmem:[#allocation5_spill] sm:$0xff]  ;;  %vm3611_vm6 = vmand %vm823_vm4, %vm833_vm1 }
 0x14f   : > { %3992 = vst [vmem:[#allocation14_spill] sm:$0xff] %v3529_v46  ;;  %v983_v5 = vmul.f32 %v2530_v56, %v917_v47  ;;  %v1105_v41 = vmul.f32 %v2532_v57, %v917_v47  ;;  %v1223_v3 = vmul.f32 %v2547_v2, %v917_v47  ;;  %v1257_v23 = vmul.f32 %v2536_v61, %v917_v47  ;;  %vm874_vm2 = vmand %vm3611_vm6, %vm844_vm5 }
 0x150   : > { %3993 = vst [vmem:[#allocation15_spill] sm:$0xff] %v3532_v13  ;;  %v948_v16 = vmul.f32 %v2534_v59, %v917_v47  ;;  %v1378_v10 = vmul.f32 %v2538_v62, %v917_v47  ;;  %v1496_v53 = vmul.f32 %v2556_v6, %v917_v47  ;;  %v1529_v45 = vmul.f32 %v2540_v63, %v917_v47  ;;  %vm909_vm5 = vmand %vm3611_vm6, %vm879_vm8 }
 0x151   : > { %3994 = vst [vmem:[#allocation40_spill] sm:$0xff] %v3546_v8  ;;  %v1036_v40 = vrot.slane %v983_v5, 1  ;;  %v1158_v55 = vrot.slane %v1105_v41, 2  ;;  %v1307_v13 = vrot.slane %v1257_v23, 1  ;;  %v1650_v8 = vmul.f32 %v3423_v35, %v917_v47 }
 0x152   : > { %2214 = vst [vmem:[%s2429_s11 + $0x18] sm:$0xff] %v2190_v36   ;;  %v1239_v36 = vadd.f32 %v1223_v3, %v3996_v4  ;;  %v1428_v54 = vrot.slane %v1378_v10, 2  ;;  %v1512_v37 = vadd.f32 %v1496_v53, %v3997_v22  ;;  %v1577_v0 = vrot.slane %v1529_v45, 1  ;;  %v4002_v4 = vld [vmem:[#allocation6_spill] sm:$0xff] }
 0x153   : > { %v3998_v30 = vrot.slane %v3324_v20, 1  ;;  %v4000_v17 = vrot.slane %v3999_v51, 1  ;;  %v4001_v5 = vrot.slane %v3327_v9, 2  ;;  %v4003_v23 = vrot.slane %v4002_v4, 2  ;;  %v4011_v4 = vld [vmem:[#allocation9_spill] sm:$0xff] }
 0x154   : > { %v4004_v47 = vrot.slane %v3338_v28, 1  ;;  %v4010_v28 = vrot.slane %v3377_v26, 1 }
 0x155   : > { %v1037_v46 = vsel %vm1024_vm14, %v3998_v30, %v1036_v40  ;;  %v1039_v1 = vsel %vm1024_vm14, %v1036_v40, %v4000_v17  ;;  %v1159_v41 = vsel %vm1146_vm15, %v4001_v5, %v1158_v55  ;;  %v1161_v3 = vsel %vm1146_vm15, %v1158_v55, %v4003_v23  ;;  %v4005_v30 = vld [vmem:[#allocation7_spill] sm:$0xff]  ;;  %v4008_v5 = vld [vmem:[#allocation8_spill] sm:$0xff] }
 0x156   : > { %v1085_v22 = vadd.f32 %v1037_v46, %v3335_v52  ;;  %v1086_v53 = vadd.f32 %v1039_v1, %v948_v16  ;;  %v1308_v20 = vsel %vm1024_vm14, %v4004_v47, %v1307_v13  ;;  %v4006_v45 = vrot.slane %v4005_v30, 1 }
 0x157   : > { %v1359_v17 = vadd.f32 %v1308_v20, %v3367_v27  ;;  %v4007_v40 = vrot.slane %v3370_v58, 2  ;;  %v4009_v55 = vrot.slane %v4008_v5, 2  ;;  %v1578_v16 = vsel %vm1024_vm14, %v4010_v28, %v1577_v0  ;;  %v665_v58 = vpop.f32.mrf.mxu3 }
 0x158   : > { %v1310_v51 = vsel %vm1024_vm14, %v1307_v13, %v4006_v45  ;;  %v1207_v1 = vadd.f32 %v1159_v41, %v1085_v22  ;;  %v1208_v46 = vadd.f32 %v1161_v3, %v1086_v53  ;;  %v4012_v23 = vrot.slane %v4011_v4, 1  ;;  %v4015_v3 = vld [vmem:[#allocation22_spill] sm:$0xff]  ;;  %v4016_v22 = vld [vmem:[#allocation24_spill] sm:$0xff]  ;;  %v4027_v4 = vld [vmem:[#allocation33_spill] sm:$0xff] }
 0x159   : > { %v1360_v9 = vadd.f32 %v1310_v51, %v1239_v36  ;;  %v1429_v10 = vsel %vm1146_vm15, %v4007_v40, %v1428_v54  ;;  %v1431_v52 = vsel %vm1146_vm15, %v1428_v54, %v4009_v55  ;;  %v1632_v54 = vadd.f32 %v1578_v16, %v3429_v11  ;;  %v4018_v51 = vld [vmem:[#allocation26_spill] sm:$0xff] }
 0x15a   : > { %v1580_v13 = vsel %vm1024_vm14, %v1577_v0, %v4012_v23  ;;  %v1480_v36 = vadd.f32 %v1429_v10, %v1359_v17  ;;  %v1240_v26 = vadd.f32 %v4015_v3, %v1207_v1  ;;  %v1241_v53 = vadd.f32 %v4016_v22, %v1208_v46  ;;  %v4020_v17 = vld [vmem:[#allocation32_spill] sm:$0xff]  ;;  %v4021_v10 = vld [vmem:[#allocation34_spill] sm:$0xff]  ;;  %v4026_v1 = vld [vmem:[#allocation37_spill] sm:$0xff] }
 0x15b   : > { %v1481_v47 = vadd.f32 %v1431_v52, %v1360_v9  ;;  %v1633_v41 = vadd.f32 %v1580_v13, %v1512_v37  ;;  %v1698_v20 = vrot.slane %v1650_v8, 2  ;;  %v797_v30 = vmin.f32 %v767_v18, 6.0  ;;  %v4025_v52 = vld [vmem:[#allocation36_spill] sm:$0xff]  ;;  %v4028_v13 = vld [vmem:[#allocation35_spill] sm:$0xff] }
 0x15c   : > { %v3619_v0 = vadd.f32 %v1505_v60, %v3229_v19  ;;  %v1513_v45 = vadd.f32 %v4017_v25, %v1480_v36  ;;  %v4019_v11 = vmax.f32 %v3478_v49, 0.0  ;;  %v1361_v9 = vadd.f32 %v4020_v17, %v1240_v26  ;;  %v4023_v60 = vld [vmem:[#allocation10_spill] sm:$0xff]  ;;  %v4030_v26 = vld [vmem:[#allocation39_spill] sm:$0xff] }
 0x15d   : > { %v1514_v40 = vadd.f32 %v4018_v51, %v1481_v47  ;;  %v1362_v8 = vadd.f32 %v4021_v10, %v1241_v53  ;;  %v4022_v18 = vrot.slane %v3380_v29, 2  ;;  %v4024_v5 = vrot.slane %v4023_v60, 2  ;;  %v4029_v47 = vld [vmem:[#allocation38_spill] sm:$0xff] }
 0x15e   : > { %v792_v37 = vmin.f32 %v4019_v11, 6.0  ;;  %v1634_v38 = vadd.f32 %v4025_v52, %v1513_v45  ;;  %v3641_v49 = vmul.f32 %v3423_v35, %v3518_v43  ;;  %v1482_v23 = vadd.f32 %v4027_v4, %v1361_v9 }
 0x15f   : > { %v1699_v19 = vsel %vm1146_vm15, %v4022_v18, %v1698_v20  ;;  %v1701_v55 = vsel %vm1146_vm15, %v1698_v20, %v4024_v5  ;;  %v1635_v46 = vadd.f32 %v4026_v1, %v1514_v40  ;;  %v1483_v29 = vadd.f32 %v4028_v13, %v1362_v8  ;;  %v3666_v24 = vpop.f32.mrf.mxu3 }
 0x160   : > { %v1753_v28 = vadd.f32 %v1699_v19, %v1632_v54  ;;  %v1754_v16 = vadd.f32 %v1701_v55, %v1633_v41  ;;  %v937_v36 = vsel %vm874_vm2, %v797_v30, 0.0  ;;  %v1755_v3 = vadd.f32 %v4029_v47, %v1634_v38  ;;  %v4031_v41 = vld [vmem:[#allocation48_spill] sm:$0xff] }
 0x161   : > { %v1756_v22 = vadd.f32 %v4030_v26, %v1635_v46  ;;  %v1601_v54 = vrot.slane %v3563_v50, 1  ;;  %v1515_v25 = vadd.f32 %v4031_v41, %v1482_v23  ;;  %v1516_v43 = vadd.f32 %v3332_v12, %v1483_v29 }
 0x162   : > { %v1773_v53 = vmul.f32 %v3444_v48, %v1753_v28  ;;  %v1774_v20 = vmul.f32 %v3444_v48, %v1754_v16  ;;  %v932_v45 = vsel %vm2780_vm11, %v792_v37, 0.0  ;;  %v1775_v51 = vmul.f32 %v3444_v48, %v1755_v3 }
 0x163   : > { %v1776_v30 = vmul.f32 %v3444_v48, %v1756_v22  ;;  %v1722_v17 = vrot.slane %v3641_v49, 2  ;;  %v3660_v9 = vmul.f32 %v2556_v6, %v937_v36  ;;  %v3663_v50 = vmul.f32 %v2540_v63, %v937_v36  ;;  %v4033_v22 = vld [vmem:[#allocation28_spill] sm:$0xff] }
 0x164   : > { %v1793_v40 = vadd.f32 %v3460_v44, %v1773_v53  ;;  %v1794_v11 = vadd.f32 %v3460_v44, %v1774_v20  ;;  %v704_v12 = vmul.f32 %v3451_v31, %v665_v58  ;;  %v1795_v37 = vadd.f32 %v3460_v44, %v1775_v51 }
 0x165   : > { %v1796_v10 = vadd.f32 %v3460_v44, %v1776_v30  ;;  %v1636_v19 = vadd.f32 %v3491_v15, %v1515_v25  ;;  %v1637_v60 = vadd.f32 %v3503_v14, %v1516_v43  ;;  %v3673_v5 = vmul.f32 %v3423_v35, %v937_v36  ;;  %v4036_v25 = vld [vmem:[#allocation29_spill] sm:$0xff] }
 0x166   : > { %v1809_v8 = vmax.f32 %v1793_v40, 0.0  ;;  %v1810_v18 = vmax.f32 %v1794_v11, 0.0  ;;  %v1233_v55 = vmul.f32 %v2547_v2, %v932_v45  ;;  %v1811_v52 = vmax.f32 %v1795_v37, 0.0 }
 0x167   : > { %v1812_v58 = vmax.f32 %v1796_v10, 0.0  ;;  %v1272_v28 = vmul.f32 %v2536_v61, %v932_v45  ;;  %v1393_v16 = vmul.f32 %v2538_v62, %v932_v45  ;;  %v1506_v15 = vmul.f32 %v2556_v6, %v932_v45  ;;  %v670_v30 = vpop.f32.mrf.mxu3 }
 0x168   : > { %v1825_v38 = vmin.f32 %v1809_v8, 6.0  ;;  %v1826_v1 = vmin.f32 %v1810_v18, 6.0  ;;  %v1249_v46 = vadd.f32 %v1233_v55, %v3240_v42  ;;  %v1827_v49 = vmin.f32 %v1811_v52, 6.0 }
 0x169   : > { %v3680_v14 = vmin.f32 %v1812_v58, 6.0  ;;  %v1332_v2 = vrot.slane %v1272_v28, 1  ;;  %v1453_v13 = vrot.slane %v1393_v16, 2  ;;  %v1522_v29 = vadd.f32 %v1506_v15, %v3242_v39  ;;  %v4038_v58 = vld [vmem:[#allocation30_spill] sm:$0xff]  ;;  %v4040_v16 = vld [vmem:[#allocation31_spill] sm:$0xff] }
 0x16a   : > { %v2175_v4 = vpack.c.bf16 %v1826_v1, %v1825_v38  ;;  %v1874_v23 = vadd.f32 %v1826_v1, %v1825_v38  ;;  %v1544_v36 = vmul.f32 %v2540_v63, %v932_v45  ;;  %v1665_v62 = vmul.f32 %v3423_v35, %v932_v45 }
 0x16b   : > { %v2180_v42 = vpack.c.bf16 %v3680_v14, %v1827_v49  ;;  %v738_v47 = vadd.f32 %v3470_v21, %v704_v12  ;;  %v4032_v3 = vrot.slane %v3538_v32, 1  ;;  %v4034_v53 = vrot.slane %v4033_v22, 1  ;;  %v4050_v22 = vld [vmem:[#allocation25_spill] sm:$0xff] }
 0x16c   : > { %2176 = vst [vmem:[%s2429_s11] sm:$0xff] %v2175_v4   ;;  %v3686_v61 = vadd.f32 %v1874_v23, %v1827_v49  ;;  %v4035_v39 = vrot.slane %v3542_v34, 2  ;;  %v4037_v43 = vrot.slane %v4036_v25, 2  ;;  %v1602_v32 = vrot.slane %v1544_v36, 1  ;;  %v4045_v36 = vld [vmem:[#allocation54_spill] sm:$0xff] }
 0x16d   : > { %v1333_v26 = vsel %vm1024_vm14, %v4032_v3, %v1332_v2  ;;  %v1335_v20 = vsel %vm1024_vm14, %v1332_v2, %v4034_v53  ;;  %2212 = vst [vmem:[%s2429_s11 + $0x8] sm:$0xff] %v2180_v42   ;;  %v1723_v12 = vrot.slane %v1665_v62, 2  ;;  %v768_v37 = vmax.f32 %v738_v47, 0.0  ;;  %v4043_v2 = vld [vmem:[#allocation57_spill] sm:$0xff]  ;;  %v4048_v47 = vld [vmem:[#allocation12_spill] sm:$0xff] }
 0x16e   : > { %v1454_v41 = vsel %vm1146_vm15, %v4035_v39, %v1453_v13  ;;  %v1456_v51 = vsel %vm1146_vm15, %v1453_v13, %v4037_v43  ;;  %v1369_v40 = vadd.f32 %v1333_v26, %v3557_v7  ;;  %v1370_v11 = vadd.f32 %v1335_v20, %v1249_v46 }
 0x16f   : > { %v958_v10 = vmul.f32 %v2534_v59, %v932_v45  ;;  %v998_v8 = vmul.f32 %v2530_v56, %v932_v45  ;;  %v1120_v34 = vmul.f32 %v2532_v57, %v932_v45  ;;  %v1603_v52 = vsel %vm1024_vm14, %v1601_v54, %v1602_v32  ;;  %v4042_v56 = vld [vmem:[#allocation44_spill] sm:$0xff] }
 0x170   : > { %v1490_v18 = vadd.f32 %v1454_v41, %v1369_v40  ;;  %v1491_v55 = vadd.f32 %v1456_v51, %v1370_v11  ;;  %v4039_v38 = vrot.slane %v4038_v58, 1  ;;  %v1642_v7 = vadd.f32 %v1603_v52, %v3619_v0  ;;  %v4054_v41 = vld [vmem:[#allocation11_spill] sm:$0xff]  ;;  %v4055_v51 = vld [vmem:[#allocation40_spill] sm:$0xff] }
 0x171   : > { %v1724_v28 = vsel %vm1146_vm15, %v1722_v17, %v1723_v12  ;;  %v4041_v15 = vrot.slane %v4040_v16, 2  ;;  %v798_v57 = vmin.f32 %v768_v37, 6.0  ;;  %v1061_v45 = vrot.slane %v998_v8, 1  ;;  %v4056_v11 = vld [vmem:[#allocation27_spill] sm:$0xff]  ;;  %v4058_v8 = vld [vmem:[#allocation50_spill] sm:$0xff]  ;;  %v4063_v16 = vld [vmem:[#allocation60_spill] sm:$0xff] }
 0x172   : > { %v1605_v1 = vsel %vm1024_vm14, %v1602_v32, %v4039_v38  ;;  %v1523_v49 = vadd.f32 %v4042_v56, %v1490_v18  ;;  %v1183_v4 = vrot.slane %v1120_v34, 2  ;;  %v1757_v54 = vadd.f32 %v3508_v33, %v1636_v19  ;;  %v4052_v19 = vld [vmem:[#allocation14_spill] sm:$0xff]  ;;  %v4059_v18 = vld [vmem:[#allocation59_spill] sm:$0xff]  ;;  %v4060_v38 = vld [vmem:[#allocation20_spill] sm:$0xff] }
 0x173   : > { %v1643_v46 = vadd.f32 %v1605_v1, %v1522_v29  ;;  %v1726_v59 = vsel %vm1146_vm15, %v1723_v12, %v4041_v15  ;;  %v4044_v13 = vrot.slane %v4043_v2, 2  ;;  %v4046_v42 = vrot.slane %v4045_v36, 2  ;;  %v4047_v29 = vld [vmem:[#allocation56_spill] sm:$0xff]  ;;  %v4061_v1 = vld [vmem:[#allocation53_spill] sm:$0xff]  ;;  %v4064_v56 = vld [vmem:[#allocation43_spill] sm:$0xff] }
 0x174   : > { %v1524_v17 = vadd.f32 %v4047_v29, %v1491_v55  ;;  %v3726_v62 = vsel %vm3611_vm6, %v798_v57, 0.0  ;;  %v4049_v3 = vrot.slane %v4048_v47, 1  ;;  %v4051_v53 = vrot.slane %v4050_v22, 1  ;;  %v4067_v29 = vld [vmem:[#allocation58_spill] sm:$0xff] }
 0x175   : > { %v1764_v23 = vadd.f32 %v1726_v59, %v1643_v46  ;;  %v1461_v0 = vsel %vm1146_vm15, %v4046_v42, %v4044_v13  ;;  %v4053_v20 = vrot.slane %v4052_v19, 2  ;;  %v1758_v25 = vadd.f32 %v4054_v41, %v1637_v60  ;;  %v4062_v46 = vld [vmem:[#allocation51_spill] sm:$0xff]  ;;  %v4066_v42 = vld [vmem:[#allocation49_spill] sm:$0xff] }
 0x176   : > { %v1062_v26 = vsel %vm1024_vm14, %v4049_v3, %v1061_v45  ;;  %v1064_v33 = vsel %vm1024_vm14, %v1061_v45, %v4051_v53  ;;  %v1763_v43 = vadd.f32 %v1724_v28, %v1642_v7  ;;  %v4057_v32 = vrot.slane %v4056_v11, 2 }
 0x177   : > { %v1184_v39 = vsel %vm1146_vm15, %v4053_v20, %v1183_v4  ;;  %v1095_v30 = vadd.f32 %v1062_v26, %v4055_v51  ;;  %v1096_v40 = vadd.f32 %v1064_v33, %v958_v10  ;;  %v3744_v37 = vmul.f32 %v2540_v63, %v3726_v62  ;;  %v4068_v33 = vld [vmem:[#allocation13_spill] sm:$0xff] }
 0x178   : > { %v1186_v12 = vsel %vm1146_vm15, %v1183_v4, %v4057_v32  ;;  %v1644_v34 = vadd.f32 %v4058_v8, %v1523_v49  ;;  %v1645_v55 = vadd.f32 %v4059_v18, %v1524_v17  ;;  %v1611_v52 = vrot.slane %v3663_v50, 1  ;;  %v4065_v49 = vld [vmem:[#allocation55_spill] sm:$0xff]  ;;  %v4069_v20 = vld [vmem:[#allocation41_spill] sm:$0xff] }
 0x179   : > { %v1217_v58 = vadd.f32 %v1184_v39, %v1095_v30  ;;  %v1218_v60 = vadd.f32 %v1186_v12, %v1096_v40  ;;  %v1761_v7 = vadd.f32 %v4061_v1, %v4060_v38  ;;  %v1732_v10 = vrot.slane %v3673_v5, 2 }
 0x17a   : > { %v1765_v28 = vadd.f32 %v4062_v46, %v1644_v34  ;;  %v1766_v15 = vadd.f32 %v4063_v16, %v1645_v55  ;;  %v1777_v59 = vmul.f32 %v3444_v48, %v1757_v54  ;;  %v1778_v4 = vmul.f32 %v3444_v48, %v1758_v25 }
 0x17b   : > { %v1250_v57 = vadd.f32 %v4064_v56, %v1217_v58  ;;  %v1251_v45 = vadd.f32 %v4065_v49, %v1218_v60  ;;  %v1781_v50 = vmul.f32 %v3444_v48, %v1761_v7  ;;  %v1612_v2 = vrot.slane %v3744_v37, 1 }
 0x17c   : > { %v3762_v13 = vmul.f32 %v3423_v35, %v3726_v62  ;;  %v1783_v5 = vmul.f32 %v3444_v48, %v1763_v43  ;;  %v1784_v36 = vmul.f32 %v3444_v48, %v1764_v23  ;;  %v1785_v47 = vmul.f32 %v3444_v48, %v1765_v28 }
 0x17d   : > { %v1371_v54 = vadd.f32 %v4066_v42, %v1250_v57  ;;  %v1372_v17 = vadd.f32 %v4067_v29, %v1251_v45  ;;  %v1786_v3 = vmul.f32 %v3444_v48, %v1766_v15  ;;  %v1797_v26 = vadd.f32 %v3460_v44, %v1777_v59  ;;  %v4072_v29 = vld [vmem:[#allocation15_spill] sm:$0xff] }
 0x17e   : > { %v1798_v22 = vadd.f32 %v3460_v44, %v1778_v4  ;;  %v1801_v53 = vadd.f32 %v3460_v44, %v1781_v50  ;;  %v1802_v19 = vadd.f32 %v3460_v44, %v4068_v33  ;;  %v1803_v41 = vadd.f32 %v3460_v44, %v1783_v5 }
 0x17f   : > { %v1492_v39 = vadd.f32 %v4069_v20, %v1371_v54  ;;  %v1493_v23 = vadd.f32 %v1461_v0, %v1372_v17  ;;  %v1804_v25 = vadd.f32 %v3460_v44, %v1784_v36  ;;  %v1805_v43 = vadd.f32 %v3460_v44, %v1785_v47  ;;  %v4070_v54 = vld [vmem:[#allocation21_spill] sm:$0xff] }
 0x180   : > { %v1806_v51 = vadd.f32 %v3460_v44, %v1786_v3  ;;  %v1813_v30 = vmax.f32 %v1797_v26, 0.0  ;;  %v1814_v40 = vmax.f32 %v1798_v22, 0.0  ;;  %v1613_v32 = vsel %vm1024_vm14, %v1611_v52, %v1612_v2 }
 0x181   : > { %v1525_v11 = vadd.f32 %v3660_v9, %v1492_v39  ;;  %v1817_v12 = vmax.f32 %v1801_v53, 0.0  ;;  %v1818_v8 = vmax.f32 %v1802_v19, 0.0  ;;  %v1819_v34 = vmax.f32 %v1803_v41, 0.0 }
 0x182   : > { %v1820_v0 = vmax.f32 %v1804_v25, 0.0  ;;  %v1821_v18 = vmax.f32 %v1805_v43, 0.0  ;;  %v1822_v55 = vmax.f32 %v1806_v51, 0.0  ;;  %v1733_v58 = vrot.slane %v3762_v13, 2 }
 0x183   : > { %v1829_v60 = vmin.f32 %v1813_v30, 6.0  ;;  %v1830_v38 = vmin.f32 %v1814_v40, 6.0  ;;  %v1833_v1 = vmin.f32 %v1817_v12, 6.0  ;;  %v1834_v7 = vmin.f32 %v1818_v8, 6.0 }
 0x184   : > { %v1835_v46 = vmin.f32 %v1819_v34, 6.0  ;;  %v1836_v9 = vmin.f32 %v1820_v0, 6.0  ;;  %v1837_v28 = vmin.f32 %v1821_v18, 6.0  ;;  %v1646_v16 = vadd.f32 %v1613_v32, %v1525_v11 }
 0x185   : > { %v1838_v52 = vmin.f32 %v1822_v55, 6.0  ;;  %v2185_v15 = vpack.c.bf16 %v1830_v38, %v1829_v60  ;;  %v1876_v59 = vadd.f32 %v3686_v61, %v3680_v14  ;;  %v2195_v56 = vpack.c.bf16 %v1834_v7, %v1833_v1  ;;  %v1873_v55 = vld [vmem:[%s2419_s19] sm:$0x1] }
 0x186   : > { %v2200_v57 = vpack.c.bf16 %v1836_v9, %v1835_v46  ;;  %v705_v49 = vmul.f32 %v3451_v31, %v3666_v24  ;;  %v1734_v50 = vsel %vm1146_vm15, %v1732_v10, %v1733_v58  ;;  %v1510_v31 = vmul.f32 %v2556_v6, %v3726_v62 }
 0x187   : > { %2213 = vst [vmem:[%s2429_s11 + $0x10] sm:$0xff] %v2185_v15   ;;  %v2205_v45 = vpack.c.bf16 %v1838_v52, %v1837_v28  ;;  %v1877_v4 = vadd.f32 %v1876_v59, %v1829_v60  ;;  %v1767_v5 = vadd.f32 %v1734_v50, %v1646_v16 }
 0x188   : > { %2215 = vst [vmem:[%s2429_s11 + $0x20] sm:$0xff] %v2195_v56   ;;  %v739_v13 = vadd.f32 %v3470_v21, %v705_v49  ;;  %v1526_v22 = vadd.f32 %v1510_v31, %v1493_v23 }
 0x189   : > { %2216 = vst [vmem:[%s2429_s11 + $0x28] sm:$0xff] %v2200_v57   ;;  %v1878_v36 = vadd.f32 %v1877_v4, %v1830_v38  ;;  %v1787_v10 = vmul.f32 %v3444_v48, %v1767_v5 }
 0x18a   : > { %2217 = vst [vmem:[%s2429_s11 + $0x30] sm:$0xff] %v2205_v45   ;;  %v769_v42 = vmax.f32 %v739_v13, 0.0 }
 0x18b   : > { %v1879_v14 = vadd.f32 %v1878_v36, %v4070_v54  ;;  %v1807_v53 = vadd.f32 %v3460_v44, %v1787_v10 }
 0x18c   : > { %v799_v24 = vmin.f32 %v769_v42, 6.0 }
 0x18d   : > { %v1880_v21 = vadd.f32 %v1879_v14, %v4072_v29  ;;  %v1823_v39 = vmax.f32 %v1807_v53, 0.0 }
 0x18e   : > { %v939_v17 = vsel %vm909_vm5, %v799_v24, 0.0 }
 0x18f   : > { %v1881_v47 = vadd.f32 %v1880_v21, %v1833_v1  ;;  %v1551_v3 = vmul.f32 %v2540_v63, %v939_v17  ;;  %v1672_v26 = vmul.f32 %v3423_v35, %v939_v17  ;;  %v1839_v23 = vmin.f32 %v1823_v39, 6.0 }
 0x191   : > { %v1882_v33 = vadd.f32 %v1881_v47, %v1834_v7  ;;  %v1614_v27 = vrot.slane %v1551_v3, 1  ;;  %v1735_v19 = vrot.slane %v1672_v26, 2 }
 0x193   : > { %v1883_v20 = vadd.f32 %v1882_v33, %v1835_v46  ;;  %v1615_v6 = vsel %vm1024_vm14, %v1612_v2, %v1614_v27  ;;  %v1736_v25 = vsel %vm1146_vm15, %v1733_v58, %v1735_v19 }
 0x194   : > { %v1647_v62 = vadd.f32 %v1615_v6, %v1526_v22 }
 0x195   : > { %v1884_v41 = vadd.f32 %v1883_v20, %v1836_v9 }
 0x196   : > { %v1768_v63 = vadd.f32 %v1736_v25, %v1647_v62 }
 0x197   : > { %v1885_v43 = vadd.f32 %v1884_v41, %v1837_v28 }
 0x198   : > { %v1788_v35 = vmul.f32 %v3444_v48, %v1768_v63 }
 0x199   : > { %v1886_v51 = vadd.f32 %v1885_v43, %v1838_v52 }
 0x19a   : > { %v1808_v30 = vadd.f32 %v3460_v44, %v1788_v35 }
 0x19b   : > { %v1887_v40 = vadd.f32 %v1886_v51, %v1839_v23 }
 0x19c   : > { %v1824_v37 = vmax.f32 %v1808_v30, 0.0 }
 0x19e   : > { %v1840_v11 = vmin.f32 %v1824_v37, 6.0 }
 0x1a0   : > { %v2210_v2 = vpack.c.bf16 %v1840_v11, %v1839_v23  ;;  %v1888_v32 = vadd.f32 %v1887_v40, %v1840_v11 }
 0x1a2   : > { %2218 = vst [vmem:[%s2429_s11 + $0x38] sm:$0xff] %v2210_v2   ;;  %v1889_v12 = vrot.slane %v1888_v32, 4 }
 0x1a4   : > { %v1890_v8 = vadd.f32 %v1889_v12, %v1888_v32 }
 0x1a6   : > { %v1891_v34 = vrot.slane %v1890_v8, 2 }
 0x1a8   : > { %v1892_v0 = vadd.f32 %v1891_v34, %v1890_v8 }
 0x1aa   : > { %v1893_v18 = vrot.slane %v1892_v0, 1 }
 0x1ac   : > { %v1894_v58 = vadd.f32 %v1893_v18, %v1892_v0 }
 0x1ae   : > { %v1895_v60 = vadd.f32 %v1894_v58, %v1873_v55 }
 0x1b0   : > { %1896 = vst [vmem:[%s2419_s19] sm:$0x1] %v1895_v60 }
 0x1b1 PF: > { %s19_s9 = sadd.s32 1, %s2331_s9   ;;  %s4073_s17 = sld [smem:[#allocation2_spill]] }
 0x1b2   : > { %p16_p8 = scmp.ge.s32.totalorder %s19_s9, 6   ;;  %s4074_s27 = smov %s2323_s29 }
 0x1b3   : > { %s4075_s28 = smov %s2327_s30  ;;  %s4076_s29 = smov %s4079_s10 }
 0x1b4   :  { %18 = sbr.rel (!%p16_p8) target bundleno = 3 (0x3), region = 95 }
 0x1b7   : > { %s4077_s30 = smov %s4073_s17 }

</bundles_post_ra>
